<compile_context>
chip_gen: v6e
topology: v6e:2x2x1
jax: 0.10.0
libtpu: 0.0.40
codegen_flags: <defaults>
</compile_context>

<pallas_src>
import functools

import numpy as np
import jax
import jax.numpy as jnp
from jax.experimental import pallas as pl
from jax.experimental.pallas import tpu as pltpu

_LANE = 128
_MAX_LOSS_TILE_ROWS = 512            # 512 * 128 = 65536 anchors per loss-kernel tile
_DIST_BLOCK_BYTES = 2 * 1024 * 1024  # per-step output block budget for the dist kernel
_VMEM_LIMIT = 32 * 1024 * 1024


def _anchor_tiling(n):
    """Pad flattened anchor axis N and pick a (rows, 128) loss-kernel tiling."""
    rows = -(-n // _LANE)
    n_tiles = max(1, -(-rows // _MAX_LOSS_TILE_ROWS))
    tile_rows = -(-rows // n_tiles)
    tile_rows = -(-tile_rows // 16) * 16        # multiple of 16 (bf16 sublane packing)
    return n_tiles * tile_rows * _LANE, tile_rows, n_tiles


def _dist_rows(s_total, mp):
    """Largest multiple-of-8 row count dividing s_total with Mp*rows*128*4 <= budget."""
    cap = _DIST_BLOCK_BYTES // (mp * _LANE * 4)
    cap = max(8, min(cap, s_total))
    r = (cap // 8) * 8
    while r > 8 and s_total % r != 0:
        r -= 8
    return r


# ----------------------------------------------------------------------------
# In-kernel helpers (anchor coordinates from flat index, no DMA'd anchor table)
# ----------------------------------------------------------------------------
def _floordiv_const(n, c):
    """Exact n // c for non-negative int32 n and positive python int c (VPU-safe:
    float reciprocal multiply + one-step correction, no integer divide needed)."""
    if c == 1:
        return n
    q = jnp.floor(n.astype(jnp.float32) * np.float32(1.0 / c)).astype(jnp.int32)
    r = n - q * c
    q = jnp.where(r >= c, q + 1, q)
    q = jnp.where(r < 0, q - 1, q)
    return q


def _zyx_from_flat(n, dims):
    """Flat anchor index -> (z, y, x) grid coordinates as f32 (grid_cell_offset=0)."""
    _, h, w = dims
    hw = h * w
    z = _floordiv_const(n, hw)
    rem = n - z * hw
    y = _floordiv_const(rem, w)
    x = rem - y * w
    return z.astype(jnp.float32), y.astype(jnp.float32), x.astype(jnp.float32)


def _reduce_rows(x, rows):
    """(rows, 128) -> (8, 128) partial sums (rows % 8 == 0), sublane-aligned slices."""
    acc = x[0:8, :]
    for i in range(1, rows // 8):
        acc = acc + x[8 * i:8 * (i + 1), :]
    return acc


# ----------------------------------------------------------------------------
# Pallas kernels
# ----------------------------------------------------------------------------
def _dist_kernel(gt_ref, out_ref, *, dims, n_valid, tile_n, spacing):
    """out[0, m, j] = -sum_k ((gt_scaled[m, k] - anchor_k * spacing[k]))^2
    for anchor flat index n = tile*tile_n + j; padded anchors get -1e30.

    gt_ref:  (1, Mp, 3) f32, GT centers in grid coords pre-scaled by spacing.
    out_ref: (1, Mp, tile_n) f32.
    """
    t = pl.program_id(1)
    j = jax.lax.broadcasted_iota(jnp.int32, (1, tile_n), 1)
    n = t * tile_n + j
    valid = n < n_valid
    zf, yf, xf = _zyx_from_flat(n, dims)
    az = zf * spacing[0]
    ay = yf * spacing[1]
    ax = xf * spacing[2]
    penalty = jnp.where(valid, 0.0, -1e30)          # (1, tile_n)

    gtb = gt_ref[0]                                 # (Mp, 3)
    d = gtb[:, 0:1] - az
    acc = d * d
    d = gtb[:, 1:2] - ay
    acc = acc + d * d
    d = gtb[:, 2:3] - ax
    acc = acc + d * d
    out_ref[0] = penalty - acc                      # broadcast (1,T) over Mp


def _loss_kernel(p_sc_ref, p_off_ref, p_shp_ref, t_ctr_ref, t_shp_ref,
                 t_sc_ref, ign_ref,
                 neg_cls_ref, reg_ref, off_ref, diou_ref, pcls_ref, pcnt_ref,
                 *, dims, n_valid, rows, strides):
    """Fused per-anchor loss terms for one (batch, anchor-tile).

    Inputs (blocks), anchors rebuilt in-kernel from iota:
      p_sc_ref  (1,1,R,128) bf16 logits     t_ctr_ref (1,3,R,128) f32 GT ctr (grid)
      p_off_ref (1,3,R,128) bf16 offsets    t_shp_ref (1,3,R,128) f32 GT half-extent
      p_shp_ref (1,3,R,128) bf16 shapes     t_sc_ref  (1,1,R,128) bf16 0/1 score
      ign_ref   (1,1,R,128) bf16 0/1 ignore
    Outputs:
      neg_cls_ref (1,1,R,128) f32 negative-pool focal loss (positives zeroed)
      reg/off/diou/pcls/pcnt (1,1,8,128) f32 per-tile partial sums.
    """
    alpha = 0.75
    eps = 1e-7
    t = pl.program_id(1)

    row = jax.lax.broadcasted_iota(jnp.int32, (rows, _LANE), 0)
    lane = jax.lax.broadcasted_iota(jnp.int32, (rows, _LANE), 1)
    n = (t * rows + row) * _LANE + lane
    valid = n < n_valid
    az, ay, ax = _zyx_from_flat(n, dims)
    anc = (az, ay, ax)

    pred = p_sc_ref[0, 0].astype(jnp.float32)
    tgt = t_sc_ref[0, 0].astype(jnp.float32)
    ign = ign_ref[0, 0].astype(jnp.float32)

    is_pos = tgt > 0.5
    # single exp reused for sigmoid and the stable BCE-with-logits
    e = jnp.exp(-jnp.abs(pred))
    inv1pe = 1.0 / (1.0 + e)
    sig = jnp.where(pred >= 0.0, inv1pe, e * inv1pe)
    cls_prob = jnp.clip(sig, 1e-4, 1.0 - 1e-4)
    alpha_factor = jnp.where(is_pos, alpha, 1.0 - alpha)
    focal_w = jnp.where(is_pos, 1.0 - cls_prob, cls_prob)
    focal_w = alpha_factor * focal_w * focal_w
    bce = jnp.maximum(pred, 0.0) - pred * tgt + jnp.log1p(e)
    loss = focal_w * bce
    loss = jnp.where((ign == 0.0) & valid, loss, 0.0)
    loss = jnp.where(is_pos & (cls_prob < 0.8), 4.0 * loss, loss)   # FN re-weighting
    neg_cls_ref[0, 0] = jnp.where(is_pos, 0.0, loss)
    pos_cls = jnp.where(is_pos, loss, 0.0)

    fg = is_pos
    p_shp = p_shp_ref[0].astype(jnp.float32)        # (3, R, 128)
    p_off = p_off_ref[0].astype(jnp.float32)
    t_ctr = t_ctr_ref[0]                            # f32
    t_shp = t_shp_ref[0]

    reg_abs = (jnp.abs(p_shp[0] - t_shp[0]) + jnp.abs(p_shp[1] - t_shp[1])
               + jnp.abs(p_shp[2] - t_shp[2]))
    off_abs = (jnp.abs(p_off[0] - (t_ctr[0] - anc[0]))
               + jnp.abs(p_off[1] - (t_ctr[1] - anc[1]))
               + jnp.abs(p_off[2] - (t_ctr[2] - anc[2])))

    # bbox decode + DIoU (pred box = [(anchor+offset)*stride, 2*shape], GT derived
    # from gathered ctr/half-extent: box ctr = ctr*stride, half = half-extent).
    inter = vol1 = vol2 = c2 = rho2 = None
    for k in range(3):
        s = strides[k]
        p_c = (anc[k] + p_off[k]) * s
        p_half = p_shp[k]
        t_c = t_ctr[k] * s
        t_half = t_shp[k]
        b1l, b1h = p_c - p_half, p_c + p_half
        b2l, b2h = t_c - t_half, t_c + t_half
        ov = jnp.maximum(jnp.minimum(b1h, b2h) - jnp.maximum(b1l, b2l), 0.0)
        ck = jnp.maximum(b1h, b2h) - jnp.minimum(b1l, b2l)
        rk = (b2l + b2h) - (b1l + b1h)
        w1 = 2.0 * p_half
        w2 = 2.0 * t_half
        inter = ov if inter is None else inter * ov
        vol1 = w1 if vol1 is None else vol1 * w1
        vol2 = w2 if vol2 is None else vol2 * w2
        c2 = ck * ck if c2 is None else c2 + ck * ck
        rho2 = rk * rk if rho2 is None else rho2 + rk * rk

    inter = inter + eps
    union = vol1 + vol2 - inter
    iou = inter * pl.reciprocal(union, approx=True)
    diou = iou - 0.25 * rho2 * pl.reciprocal(c2 + eps, approx=True)

    fgf = fg.astype(jnp.float32)
    reg_ref[0, 0] = _reduce_rows(jnp.where(fg, reg_abs, 0.0), rows)
    off_ref[0, 0] = _reduce_rows(jnp.where(fg, off_abs, 0.0), rows)
    diou_ref[0, 0] = _reduce_rows(jnp.where(fg, diou, 0.0), rows)
    pcls_ref[0, 0] = _reduce_rows(pos_cls, rows)
    pcnt_ref[0, 0] = _reduce_rows(fgf, rows)


# ----------------------------------------------------------------------------
# Glue (plain JAX / numpy)
# ----------------------------------------------------------------------------
def _target_preprocess_np(annotations_list):
    batch = len(annotations_list)
    max_cnt = max(1, max(len(a["box"]) for a in annotations_list))
    m_pad = int(-(-max_cnt // 8) * 8)               # bucket M to a multiple of 8
    out = -np.ones((batch, m_pad, 7), dtype=np.float32)
    for j, a in enumerate(annotations_list):
        rows = []
        for box in a["box"]:
            z1, y1, x1, z2, y2, x2 = box
            nd, nh, nw = max(z2 - z1, 0.0), max(y2 - y1, 0.0), max(x2 - x1, 0.0)
            if nd * nh * nw == 0:
                continue
            rows.append([z1 + 0.5 * nd, y1 + 0.5 * nh, x1 + 0.5 * nw,
                         nd, nh, nw, 0.0])
        if rows:
            out[j, :len(rows)] = np.array(rows, dtype=np.float32)
    return out


def detection_loss(cls, shape, offset, annotations_list,
                   crop_size=(16, 32, 32), topk=7, spacing=(2.0, 1.0, 1.0),
                   ignore_ratio=5, num_hard=100, ratio=100):
    B = cls.shape[0]
    D, H, W = cls.shape[2], cls.shape[3], cls.shape[4]
    N = D * H * W
    Np, tile_rows, n_tiles = _anchor_tiling(N)
    S = Np // _LANE

    # TODO(synk): make_anchors is not in the provided snippet; reconstructed per
    # the standard anchor-free 3D detector convention (grid coords + per-axis stride).
    strides = (crop_size[0] / D, crop_size[1] / H, crop_size[2] / W)

    def to_tiles_bf16(x, c):
        x = x.reshape(B, c, N).astype(jnp.bfloat16)
        if Np > N:
            x = jnp.pad(x, ((0, 0), (0, 0), (0, Np - N)))
        return x.reshape(B, c, S, _LANE)

    p_sc = to_tiles_bf16(cls, 1)
    p_shp = to_tiles_bf16(shape, 3)
    p_off = to_tiles_bf16(offset, 3)

    # ---- annotation preprocessing (host) -----------------------------------
    ann = jnp.asarray(_target_preprocess_np(annotations_list))       # (B, Mp, 7)
    Mp = ann.shape[1]
    mask_gt = ann[:, :, -1] > -1                                     # (B, Mp)
    stride_row = jnp.asarray(np.array(strides, np.float32))[None, None, :]
    spacing_row = jnp.asarray(np.array(spacing, np.float32))[None, None, :]
    ctr_gt = ann[:, :, :3] / stride_row                              # grid coords
    shape_gt = ann[:, :, 3:6] / 2.0                                  # half extents
    gt_scaled = (ctr_gt * spacing_row).astype(jnp.float32)           # pre-scaled

    # ---- Pallas kernel 1: spacing-weighted negative squared distance -------
    rows_dist = _dist_rows(S, Mp)
    tile_n_dist = rows_dist * _LANE
    n_tiles_dist = S // rows_dist
    distance = pl.pallas_call(
        functools.partial(_dist_kernel, dims=(D, H, W), n_valid=N,
                          tile_n=tile_n_dist,
                          spacing=tuple(float(s) for s in spacing)),
        out_shape=jax.ShapeDtypeStruct((B, Mp, Np), jnp.float32),
        grid=(B, n_tiles_dist),
        in_specs=[pl.BlockSpec((1, Mp, 3), lambda b, t: (b, 0, 0))],
        out_specs=pl.BlockSpec((1, Mp, tile_n_dist), lambda b, t: (b, 0, t)),
        compiler_params=pltpu.CompilerParams(
            dimension_semantics=("parallel", "parallel"),
            vmem_limit_bytes=_VMEM_LIMIT),
    )(gt_scaled)

    # ---- target assignment: top-k + direct (B, Np) scatters -----------------
    # TODO(synk): top-k selection / scatter / sort-based hard-negative mining
    # have no clean Pallas TPU equivalent; kept as XLA glue (but without the
    # old (B, Mp, Np) one-hot mask intermediates).
    k_all = (ignore_ratio + 1) * topk
    _, topk_inds = jax.lax.top_k(distance, k_all)                    # (B, Mp, k_all)
    pos_inds = topk_inds[:, :, :topk].reshape(B, -1)
    ign_inds = topk_inds[:, :, topk:].reshape(B, -1)
    n_ign = k_all - topk
    b_ix = jnp.arange(B, dtype=jnp.int32)[:, None]

    m_ids = jnp.broadcast_to(jnp.arange(Mp, dtype=jnp.int32)[None, :, None],
                             (B, Mp, topk))
    pos_upd = jnp.where(mask_gt[:, :, None], m_ids, Mp).reshape(B, -1)
    gt_assign = jnp.full((B, Np), Mp, jnp.int32).at[b_ix, pos_inds].min(pos_upd)
    target_scores = gt_assign < Mp                                   # (B, Np) bool
    gt_idx = jnp.where(target_scores, gt_assign, 0)

    ign_upd = jnp.broadcast_to(mask_gt[:, :, None],
                               (B, Mp, n_ign)).astype(jnp.int32).reshape(B, -1)
    ign_any = jnp.zeros((B, Np), jnp.int32).at[b_ix, ign_inds].max(ign_upd)
    mask_ignore = ign_any > 0                                        # (B, Np) bool

    # channel-major gather of the 6 target channels (ctr grid coords + half ext)
    tbl_cm = jnp.transpose(jnp.concatenate([ctr_gt, shape_gt], axis=-1),
                           (0, 2, 1)).astype(jnp.float32)            # (B, 6, Mp)
    gidx = jnp.broadcast_to(gt_idx[:, None, :], (B, 6, Np))
    tgt_cm = jnp.take_along_axis(tbl_cm, gidx, axis=2)               # (B, 6, Np)
    t_ctr = tgt_cm[:, 0:3].reshape(B, 3, S, _LANE)
    t_shp = tgt_cm[:, 3:6].reshape(B, 3, S, _LANE)
    t_sc = target_scores.astype(jnp.bfloat16).reshape(B, 1, S, _LANE)
    ign_t = mask_ignore.astype(jnp.bfloat16).reshape(B, 1, S, _LANE)

    # ---- Pallas kernel 2: fused per-anchor loss terms -----------------------
    def in_bspec(c):
        return pl.BlockSpec((1, c, tile_rows, _LANE), lambda b, t: (b, 0, t, 0))

    stat_spec = pl.BlockSpec((1, 1, 8, _LANE), lambda b, t: (b, t, 0, 0))
    stat_shape = jax.ShapeDtypeStruct((B, n_tiles, 8, _LANE), jnp.float32)

    outs = pl.pallas_call(
        functools.partial(_loss_kernel, dims=(D, H, W), n_valid=N,
                          rows=tile_rows,
                          strides=tuple(float(s) for s in strides)),
        out_shape=[jax.ShapeDtypeStruct((B, 1, S, _LANE), jnp.float32),
                   stat_shape, stat_shape, stat_shape, stat_shape, stat_shape],
        grid=(B, n_tiles),
        in_specs=[in_bspec(1), in_bspec(3), in_bspec(3),
                  in_bspec(3), in_bspec(3), in_bspec(1), in_bspec(1)],
        out_specs=[in_bspec(1), stat_spec, stat_spec, stat_spec, stat_spec,
                   stat_spec],
        compiler_params=pltpu.CompilerParams(
            dimension_semantics=("parallel", "parallel"),
            vmem_limit_bytes=_VMEM_LIMIT),
    )(p_sc, p_off, p_shp, t_ctr, t_shp, t_sc, ign_t)
    neg_cls, reg_part, off_part, diou_part, pcls_part, pcnt_part = outs

    # ---- classification loss: hard-negative mining (sort-based top-k) -------
    # NOTE: torch's random.sample of negatives is a no-op when #negatives <=
    # num_neg (10000); padded / ignored anchors carry zero loss so including
    # them in the negative pool leaves the top-k sum unchanged.
    neg_cls = neg_cls.reshape(B, Np)
    num_pos_b = jnp.sum(pcnt_part, axis=(1, 2, 3))                   # (B,)
    pos_sum_b = jnp.sum(pcls_part, axis=(1, 2, 3))                   # (B,)
    neg_sorted = -jnp.sort(-neg_cls, axis=1)                         # descending
    k_keep = jnp.where(num_pos_b > 0, ratio * num_pos_b, float(num_hard))
    idx = jnp.arange(Np, dtype=jnp.float32)[None, :]
    neg_sum = jnp.sum(jnp.where(idx < k_keep[:, None], neg_sorted, 0.0), axis=1)
    cls_per_b = (pos_sum_b + neg_sum) / jnp.maximum(num_pos_b, 1.0)
    classification_losses = jnp.mean(cls_per_b)

    # ---- regression / offset / IoU losses over foreground anchors -----------
    num_fg = jnp.sum(num_pos_b)
    denom = jnp.maximum(num_fg, 1.0)
    reg_losses = jnp.where(num_fg > 0, jnp.sum(reg_part) / (3.0 * denom), 0.0)
    offset_losses = jnp.where(num_fg > 0, jnp.sum(off_part) / (3.0 * denom), 0.0)
    iou_losses = jnp.where(num_fg > 0, -jnp.sum(diou_part) / denom, 0.0)

    return classification_losses, reg_losses, offset_losses, iou_losses


# ----------------------------------------------------------------------------
# Test
# ----------------------------------------------------------------------------
if __name__ == "__main__":
    key = jax.random.PRNGKey(0)
    B, D, H, W = 2, 8, 16, 16
    crop_size = (16, 32, 32)            # -> strides (2, 2, 2)
    k1, k2, k3 = jax.random.split(key, 3)
    Cls = jax.random.normal(k1, (B, 1, D, H, W), jnp.float32)
    Shape = jax.random.uniform(k2, (B, 3, D, H, W), jnp.float32, 0.5, 4.0)
    Offset = 0.5 * jax.random.normal(k3, (B, 3, D, H, W), jnp.float32)

    annotations = [
        {"box": [[2.0, 4.0, 4.0, 8.0, 14.0, 16.0]]},
        {"box": [[1.0, 2.0, 3.0, 7.0, 12.0, 13.0],
                 [8.0, 16.0, 16.0, 15.0, 30.0, 30.0]]},
    ]

    cls_l, reg_l, off_l, iou_l = detection_loss(
        Cls, Shape, Offset, annotations,
        crop_size=crop_size, topk=7, spacing=(2.0, 1.0, 1.0))
    jax.block_until_ready((cls_l, reg_l, off_l, iou_l))
    print("KERNEL_OK")
</pallas_src>

<mosaic_0001>
module attributes {stable_mosaic.version = 11 : i64} {
  func.func @_dist_kernel(%arg0: i32, %arg1: i32, %arg2: memref<1x8x3xf32, #tpu.memory_space<vmem>>, %arg3: memref<1x8x2048xf32, #tpu.memory_space<vmem>>) attributes {dimension_semantics = [#tpu.dimension_semantics<parallel>, #tpu.dimension_semantics<parallel>], iteration_bounds = array<i64: 2, 1>, scalar_prefetch = 0 : i64, scratch_operands = 0 : i64, tpu.core_type = #tpu.core_type<tc>, window_params = [{transform_indices = @transform_0, window_bounds = array<i64: 1, 8, 3>}, {transform_indices = @transform_1, window_bounds = array<i64: 1, 8, 2048>}]} {
    %0 = tpu.iota {dimensions = array<i32: 1>} : vector<1x2048xi32>
    %c2048_i32 = arith.constant 2048 : i32
    %1 = arith.muli %arg1, %c2048_i32 : i32
    %2 = vector.broadcast %1 : i32 to vector<1x2048xi32>
    %3 = arith.addi %2, %0 : vector<1x2048xi32>
    %c2048_i32_0 = arith.constant 2048 : i32
    %4 = vector.broadcast %c2048_i32_0 : i32 to vector<1x2048xi32>
    %5 = arith.cmpi slt, %3, %4 : vector<1x2048xi32>
    %6 = arith.sitofp %3 : vector<1x2048xi32> to vector<1x2048xf32>
    %cst = arith.constant 3.906250e-03 : f32
    %7 = vector.broadcast %cst : f32 to vector<1x2048xf32>
    %8 = arith.mulf %6, %7 : vector<1x2048xf32>
    %9 = math.floor %8 : vector<1x2048xf32>
    %10 = arith.fptosi %9 : vector<1x2048xf32> to vector<1x2048xi32>
    %c256_i32 = arith.constant 256 : i32
    %11 = vector.broadcast %c256_i32 : i32 to vector<1x2048xi32>
    %12 = arith.muli %10, %11 : vector<1x2048xi32>
    %13 = arith.subi %3, %12 : vector<1x2048xi32>
    %c256_i32_1 = arith.constant 256 : i32
    %14 = vector.broadcast %c256_i32_1 : i32 to vector<1x2048xi32>
    %15 = arith.cmpi sge, %13, %14 : vector<1x2048xi32>
    %c1_i32 = arith.constant 1 : i32
    %16 = vector.broadcast %c1_i32 : i32 to vector<1x2048xi32>
    %17 = arith.addi %10, %16 : vector<1x2048xi32>
    %18 = arith.select %15, %17, %10 : vector<1x2048xi1>, vector<1x2048xi32>
    %c0_i32 = arith.constant 0 : i32
    %19 = vector.broadcast %c0_i32 : i32 to vector<1x2048xi32>
    %20 = arith.cmpi slt, %13, %19 : vector<1x2048xi32>
    %c1_i32_2 = arith.constant 1 : i32
    %21 = vector.broadcast %c1_i32_2 : i32 to vector<1x2048xi32>
    %22 = arith.subi %18, %21 : vector<1x2048xi32>
    %23 = arith.select %20, %22, %18 : vector<1x2048xi1>, vector<1x2048xi32>
    %c256_i32_3 = arith.constant 256 : i32
    %24 = vector.broadcast %c256_i32_3 : i32 to vector<1x2048xi32>
    %25 = arith.muli %23, %24 : vector<1x2048xi32>
    %26 = arith.subi %3, %25 : vector<1x2048xi32>
    %27 = arith.sitofp %26 : vector<1x2048xi32> to vector<1x2048xf32>
    %cst_4 = arith.constant 6.250000e-02 : f32
    %28 = vector.broadcast %cst_4 : f32 to vector<1x2048xf32>
    %29 = arith.mulf %27, %28 : vector<1x2048xf32>
    %30 = math.floor %29 : vector<1x2048xf32>
    %31 = arith.fptosi %30 : vector<1x2048xf32> to vector<1x2048xi32>
    %c16_i32 = arith.constant 16 : i32
    %32 = vector.broadcast %c16_i32 : i32 to vector<1x2048xi32>
    %33 = arith.muli %31, %32 : vector<1x2048xi32>
    %34 = arith.subi %26, %33 : vector<1x2048xi32>
    %c16_i32_5 = arith.constant 16 : i32
    %35 = vector.broadcast %c16_i32_5 : i32 to vector<1x2048xi32>
    %36 = arith.cmpi sge, %34, %35 : vector<1x2048xi32>
    %c1_i32_6 = arith.constant 1 : i32
    %37 = vector.broadcast %c1_i32_6 : i32 to vector<1x2048xi32>
    %38 = arith.addi %31, %37 : vector<1x2048xi32>
    %39 = arith.select %36, %38, %31 : vector<1x2048xi1>, vector<1x2048xi32>
    %c0_i32_7 = arith.constant 0 : i32
    %40 = vector.broadcast %c0_i32_7 : i32 to vector<1x2048xi32>
    %41 = arith.cmpi slt, %34, %40 : vector<1x2048xi32>
    %c1_i32_8 = arith.constant 1 : i32
    %42 = vector.broadcast %c1_i32_8 : i32 to vector<1x2048xi32>
    %43 = arith.subi %39, %42 : vector<1x2048xi32>
    %44 = arith.select %41, %43, %39 : vector<1x2048xi1>, vector<1x2048xi32>
    %c16_i32_9 = arith.constant 16 : i32
    %45 = vector.broadcast %c16_i32_9 : i32 to vector<1x2048xi32>
    %46 = arith.muli %44, %45 : vector<1x2048xi32>
    %47 = arith.subi %26, %46 : vector<1x2048xi32>
    %48 = arith.sitofp %23 : vector<1x2048xi32> to vector<1x2048xf32>
    %49 = arith.sitofp %44 : vector<1x2048xi32> to vector<1x2048xf32>
    %50 = arith.sitofp %47 : vector<1x2048xi32> to vector<1x2048xf32>
    %cst_10 = arith.constant 2.000000e+00 : f32
    %51 = vector.broadcast %cst_10 : f32 to vector<1x2048xf32>
    %52 = arith.mulf %48, %51 : vector<1x2048xf32>
    %cst_11 = arith.constant 1.000000e+00 : f32
    %53 = vector.broadcast %cst_11 : f32 to vector<1x2048xf32>
    %54 = arith.mulf %49, %53 : vector<1x2048xf32>
    %cst_12 = arith.constant 1.000000e+00 : f32
    %55 = vector.broadcast %cst_12 : f32 to vector<1x2048xf32>
    %56 = arith.mulf %50, %55 : vector<1x2048xf32>
    %cst_13 = arith.constant 0.000000e+00 : f32
    %cst_14 = arith.constant -1.000000e+30 : f32
    %57 = vector.broadcast %cst_13 : f32 to vector<1x2048xf32>
    %58 = vector.broadcast %cst_14 : f32 to vector<1x2048xf32>
    %59 = arith.select %5, %57, %58 : vector<1x2048xi1>, vector<1x2048xf32>
    %c0 = arith.constant 0 : index
    %c0_15 = arith.constant 0 : index
    %c0_16 = arith.constant 0 : index
    %60 = vector.load %arg2[%c0, %c0_15, %c0_16] : memref<1x8x3xf32, #tpu.memory_space<vmem>>, vector<1x8x3xf32>
    %61 = vector.shape_cast %60 : vector<1x8x3xf32> to vector<8x3xf32>
    %62 = vector.extract_strided_slice %61 {offsets = [0, 0], sizes = [8, 1], strides = [1, 1]} : vector<8x3xf32> to vector<8x1xf32>
    %63 = vector.broadcast %62 : vector<8x1xf32> to vector<8x2048xf32>
    %64 = vector.broadcast %52 : vector<1x2048xf32> to vector<8x2048xf32>
    %65 = arith.subf %63, %64 : vector<8x2048xf32>
    %66 = arith.mulf %65, %65 : vector<8x2048xf32>
    %67 = vector.extract_strided_slice %61 {offsets = [0, 1], sizes = [8, 1], strides = [1, 1]} : vector<8x3xf32> to vector<8x1xf32>
    %68 = vector.broadcast %67 : vector<8x1xf32> to vector<8x2048xf32>
    %69 = vector.broadcast %54 : vector<1x2048xf32> to vector<8x2048xf32>
    %70 = arith.subf %68, %69 : vector<8x2048xf32>
    %71 = arith.mulf %70, %70 : vector<8x2048xf32>
    %72 = arith.addf %66, %71 : vector<8x2048xf32>
    %73 = vector.extract_strided_slice %61 {offsets = [0, 2], sizes = [8, 1], strides = [1, 1]} : vector<8x3xf32> to vector<8x1xf32>
    %74 = vector.broadcast %73 : vector<8x1xf32> to vector<8x2048xf32>
    %75 = vector.broadcast %56 : vector<1x2048xf32> to vector<8x2048xf32>
    %76 = arith.subf %74, %75 : vector<8x2048xf32>
    %77 = arith.mulf %76, %76 : vector<8x2048xf32>
    %78 = arith.addf %72, %77 : vector<8x2048xf32>
    %79 = vector.broadcast %59 : vector<1x2048xf32> to vector<8x2048xf32>
    %80 = arith.subf %79, %78 : vector<8x2048xf32>
    %c0_17 = arith.constant 0 : index
    %c0_18 = arith.constant 0 : index
    %c0_19 = arith.constant 0 : index
    %81 = vector.load %arg3[%c0_17, %c0_18, %c0_19] : memref<1x8x2048xf32, #tpu.memory_space<vmem>>, vector<1x8x2048xf32>
    %82 = vector.shape_cast %81 : vector<1x8x2048xf32> to vector<8x2048xf32>
    %83 = vector.shape_cast %80 : vector<8x2048xf32> to vector<1x8x2048xf32>
    tpu.vector_store %arg3[%c0_17, %c0_18, %c0_19], %83 {strides = array<i32>} : memref<1x8x2048xf32, #tpu.memory_space<vmem>>, vector<1x8x2048xf32>,
    return
  }
  func.func @transform_0(%arg0: i32, %arg1: i32) -> (i32, i32, i32) {
    %c0_i32 = arith.constant 0 : i32
    %c0_i32_0 = arith.constant 0 : i32
    %c0_i32_1 = arith.constant 0 : i32
    return %arg0, %c0_i32, %c0_i32_0 : i32, i32, i32
  }
  func.func @transform_1(%arg0: i32, %arg1: i32) -> (i32, i32, i32) {
    %c0_i32 = arith.constant 0 : i32
    %c0_i32_0 = arith.constant 0 : i32
    return %arg0, %c0_i32, %arg1 : i32, i32, i32
  }
}

</mosaic_0001>

<bundles_post_ra>
// kernel: tpu_custom_call.1
= control target key start
LH: loop header
LB: loop body
LE: loop exit
PB: predicated region body
PF: predicated region fallthrough
CT: control target
= control target key end

     0   :  { %6 = vsyncpa [#allocation3], 0  ;;  %s2189_s0 = inlined_call_operand.vmem [shape: f32[2,8,3], index: 0, kind: input, shape index: {}]   ;;  %s2190_s1 = inlined_call_operand.hbm [shape: f32[2,8,2048], index: 1, kind: output, shape index: {}]  }
   0x1   :  { %8 = vsyncpa [#allocation3 + $0x1], 0  ;;  %s1230_s6 = smov 0   ;;  %s1232_s7 = smov 0  }
   0x2   :  { %s1234_s8 = smov 0   ;;  %s1236_s9 = smov 0  }
   0x3   :  { %s1238_s10 = smov 0   ;;  %s1240_s11 = smov 0  }
   0x4 LB: > { %s967_s12 = sadd.s32 4294967295, %s1214_s11   ;;  %s968_s13 = sadd.s32 4294967294, %s1214_s11   ;;  %s1214_s11 = sphi %s1240_s11, %s14_s11   ;;  %s1210_s10 = sphi %s1238_s10, %s2325_s10   ;;  %s1206_s9 = sphi %s1236_s9, %s2324_s9   ;;  %s1202_s8 = sphi %s1234_s8, %s2323_s8   ;;  %s1198_s7 = sphi %s1232_s7, %s2322_s7   ;;  %s1194_s6 = sphi %s1230_s6, %s2321_s6  }
   0x5   : > { %s26_s14 = sadd.s32 1, %s1210_s10  ;;  %s61_s15 = sadd.s32 1, %s1202_s8 }
   0x6   : > { %p28_p0 = scmp.ge.s32.totalorder %s26_s14, 2  ;;  %p71_p1 = scmp.ne.s32.totalorder %s1202_s8, %s1198_s7 }
   0x7   : > { %p72_p2 = scmp.eq.s32.totalorder %s967_s12, 1  ;;  %p77_p3 = scmp.ne.s32.totalorder %s1198_s7, %s1194_s6 }
   0x8   : > { %s2327_s14 = smov (%p28_p0, %s26_s14), 0  ;;  %p78_p5 = scmp.eq.s32.totalorder %s968_s13, 1 }
   0x9   : > { %p1270_p4 = por %p72_p2, %p71_p1  ;;  %s56_s17 = ssub.s32 %s1210_s10, %s2327_s14 }
   0xa   : > { %p971_p6 = scmp.ge.s32.totalorder %s1214_s11, 1  ;;  %p59_p7 = scmp.eq.s32.totalorder %s56_s17, 0 }
   0xb   : > { %p1277_p8 = por %p78_p5, %p77_p3  ;;  %p103_p9 = scmp.lt.s32.totalorder %s1214_s11, 3 }
   0xc   : > { %s1283_s19 = scalar_select %p59_p7, %s1202_s8, %s61_s15  }
   0xd   : > { %p104_p10 = pnand %p971_p6, %p103_p9 }
   0xf   : > { %107 = sbr.rel (%p104_p10) target bundleno = 218 (0xda), region = 24 }
  0x14   : > { %p122_p11 = scmp.lt.s32.totalorder %s1206_s9, 1  ;;  %v127_v0 = vlaneseq  ;;  %v1216_v1 = vmov 0   ;;  %v1217_v2 = vmov 2   ;;  %v1218_v33 = vmov 1   ;;  %s119_s25 = sand.u32 1, %s1198_s7  }
  0x15   : > { %1134 = vset.pattern.permute.xlu0 %v1216_v1  ;;  %1136 = vset.pattern.permute.xlu1 %v1217_v2  ;;  %s2134_s26 = sshll.u32 %s119_s25, 7  ;;  %s1011_s27 = sshll.u32 %s1206_s9, 11 }
  0x16   : > { %s123_s20 = scalar_select %p122_p11, %s1206_s9, 1  ;;  %v1287_v3 = vand.u32 127, %v127_v0 }
  0x17   : > { %s121_s28 = scalar_lea.vmem [#allocation2], %s2134_s26  ;;  %s2141_s3 = scalar_lea.hbm %s2190_s1, %s1011_s27 }
  0x18   : > { %s973_s21 = sshll.u32 %s123_s20, 3  ;;  %v1290_v4 = vadd.s32 128, %v1287_v3  ;;  %v1293_v5 = vadd.s32 256, %v1287_v3  ;;  %v1296_v6 = vadd.s32 384, %v1287_v3  ;;  %v1299_v7 = vadd.s32 512, %v1287_v3  ;;  %s897_s29 = sshll.u32 %s121_s28, 4  ;;  %s2143_s29 = int_to_ptr.vmem [resolvable:$true] %s897_s29 }
  0x19   : > { %s125_s24 = scalar_lea.vmem %s2189_s0, %s973_s21  ;;  %v1305_v8 = vadd.s32 640, %v1287_v3  ;;  %v1308_v9 = vadd.s32 768, %v1287_v3  ;;  %v1311_v10 = vadd.s32 896, %v1287_v3  ;;  %v1314_v11 = vadd.s32 1024, %v1287_v3  ;;  %s881_s4 = scalar_lea.sflag [#allocation3], %s119_s25 }
  0x1a   : > { %v706_v12 = vld [vmem:[%s125_s24] sm:$0xff]  ;;  %v1317_v13 = vadd.s32 1152, %v1287_v3  ;;  %v1320_v14 = vadd.s32 1280, %v1287_v3  ;;  %v1323_v15 = vadd.s32 1408, %v1287_v3  ;;  %v1326_v16 = vadd.s32 1536, %v1287_v3  ;;  %s1138_s5 = scalar_lea.vmem %s2143_s29, 2048 }
  0x1b   : > { %709 = vperm.xlu0 %1134, %v706_v12   ;;  %797 = vperm.xlu1 %1136, %v706_v12   ;;  %v1329_v17 = vadd.s32 1664, %v1287_v3  ;;  %v1332_v18 = vadd.s32 1792, %v1287_v3  ;;  %v1335_v19 = vadd.s32 1920, %v1287_v3  ;;  %v178_v20 = vcvt.s32.f32 %v1287_v3  ;;  %p1139_p12 = scmp.ne.s32.totalorder %s2143_s29, %s1138_s5  ;;  %s1219_s9 = smov [#allocation2]  }
  0x1c   : > { %2224 = vst [vmem:[#allocation5_spill] sm:$0xff] %v1323_v15  ;;  %2225 = vst [vmem:[#allocation6_spill] sm:$0xff] %v1326_v16  ;;  %v179_v21 = vcvt.s32.f32 %v1290_v4  ;;  %v180_v22 = vcvt.s32.f32 %v1293_v5  ;;  %v181_v23 = vcvt.s32.f32 %v1296_v6  ;;  %v182_v24 = vcvt.s32.f32 %v1299_v7  ;;  %s1142_s12 = sshll.u32 %s1219_s9, 4  ;;  %s1143_s12 = int_to_ptr.vmem [resolvable:$false] %s1142_s12 }
  0x1d   : > { %2226 = vst [vmem:[#allocation7_spill] sm:$0xff] %v1329_v17  ;;  %2227 = vst [vmem:[#allocation8_spill] sm:$0xff] %v1332_v18  ;;  %v183_v25 = vcvt.s32.f32 %v1305_v8  ;;  %v184_v26 = vcvt.s32.f32 %v1308_v9  ;;  %v185_v27 = vcvt.s32.f32 %v1311_v10  ;;  %v186_v28 = vcvt.s32.f32 %v1314_v11  ;;  %p1140_p13 = pnand %p1139_p12, %p1270_p4  ;;  %s1144_s13 = scalar_lea.vmem %s1143_s12, 4096 }
  0x1e   : > { %2228 = vst [vmem:[#allocation9_spill] sm:$0xff] %v1335_v19  ;;  %v187_v29 = vcvt.s32.f32 %v1317_v13  ;;  %v188_v30 = vcvt.s32.f32 %v1320_v14  ;;  %v189_v31 = vcvt.s32.f32 %v1323_v15  ;;  %v190_v32 = vcvt.s32.f32 %v1326_v16  ;;  %p1145_p1 = scmp.lt.s32.totalorder %s2143_s29, %s1143_s12  ;;  %p1146_p2 = scmp.lt.s32.totalorder %s1144_s13, %s1138_s5 }
  0x1f   : > { %1135 = vset.pattern.permute.xlu0 %v1218_v33  ;;  %v191_v34 = vcvt.s32.f32 %v1329_v17  ;;  %v192_v35 = vcvt.s32.f32 %v1332_v18  ;;  %v193_v36 = vcvt.s32.f32 %v1335_v19  ;;  %v194_v37 = vmul.f32 0.00390625, %v178_v20  ;;  %p1141_p0 = pneg %p1140_p13 }
  0x20   : > { %745 = vperm.xlu0 %1135, %v706_v12   ;;  %v195_v38 = vmul.f32 0.00390625, %v179_v21  ;;  %v196_v39 = vmul.f32 0.00390625, %v180_v22  ;;  %v197_v40 = vmul.f32 0.00390625, %v181_v23  ;;  %v198_v41 = vmul.f32 0.00390625, %v182_v24  ;;  %p1147_p3 = por %p1146_p2, %p1145_p1 }
  0x21   : > { %v199_v42 = vmul.f32 0.00390625, %v183_v25  ;;  %v200_v43 = vmul.f32 0.00390625, %v184_v26  ;;  %v201_v44 = vmul.f32 0.00390625, %v185_v27  ;;  %v202_v45 = vmul.f32 0.00390625, %v186_v28 }
  0x22   : > { %v203_v46 = vmul.f32 0.00390625, %v187_v29  ;;  %v204_v47 = vmul.f32 0.00390625, %v188_v30  ;;  %v205_v48 = vmul.f32 0.00390625, %v189_v31  ;;  %v206_v49 = vmul.f32 0.00390625, %v190_v32  ;;  %p1148_p5 = pnand %p1147_p3, %p1141_p0 }
  0x23   : > { %v207_v50 = vmul.f32 0.00390625, %v191_v34  ;;  %v208_v51 = vmul.f32 0.00390625, %v192_v35  ;;  %v209_v52 = vmul.f32 0.00390625, %v193_v36  ;;  %v210_v53 = vfloor.f32 %v194_v37 }
  0x24   : > { %1137 = vset.pattern.permute.xlu0 %v1217_v2  ;;  %v211_v54 = vfloor.f32 %v195_v38  ;;  %v212_v55 = vfloor.f32 %v196_v39  ;;  %v213_v56 = vfloor.f32 %v197_v40  ;;  %v214_v57 = vfloor.f32 %v198_v41 }
  0x25   : > { %v215_v58 = vfloor.f32 %v199_v42  ;;  %v216_v59 = vfloor.f32 %v200_v43  ;;  %v217_v60 = vfloor.f32 %v201_v44  ;;  %v218_v61 = vfloor.f32 %v202_v45 }
  0x26   : > { %v219_v62 = vfloor.f32 %v203_v46  ;;  %v220_v63 = vfloor.f32 %v204_v47  ;;  %v221_v0 = vfloor.f32 %v205_v48  ;;  %v222_v1 = vfloor.f32 %v206_v49 }
  0x27   : > { %v223_v12 = vfloor.f32 %v207_v50  ;;  %v224_v20 = vfloor.f32 %v208_v51  ;;  %v225_v21 = vfloor.f32 %v209_v52  ;;  %v1012_v22 = vtrunc.f32 %v210_v53 }
  0x28   : > { %v1014_v23 = vtrunc.f32 %v211_v54  ;;  %v1016_v24 = vtrunc.f32 %v212_v55  ;;  %v1018_v25 = vtrunc.f32 %v213_v56  ;;  %v1020_v2 = vtrunc.f32 %v214_v57 }
  0x29   : > { %v1353_v26 = vcvt.f32.s32 %v1012_v22  ;;  %v1022_v27 = vtrunc.f32 %v215_v58  ;;  %v1024_v28 = vtrunc.f32 %v216_v59  ;;  %v1026_v29 = vtrunc.f32 %v217_v60 }
  0x2a   : > { %v1355_v30 = vcvt.f32.s32 %v1014_v23  ;;  %v1357_v31 = vcvt.f32.s32 %v1016_v24  ;;  %v1359_v32 = vcvt.f32.s32 %v1018_v25  ;;  %v1361_v33 = vcvt.f32.s32 %v1020_v2 }
  0x2b   : > { %v1363_v34 = vcvt.f32.s32 %v1022_v27  ;;  %v1365_v35 = vcvt.f32.s32 %v1024_v28  ;;  %v1367_v36 = vcvt.f32.s32 %v1026_v29  ;;  %v1028_v37 = vtrunc.f32 %v218_v61 }
  0x2c   : > { %v1030_v38 = vtrunc.f32 %v219_v62  ;;  %v1032_v39 = vtrunc.f32 %v220_v63  ;;  %v1034_v40 = vtrunc.f32 %v221_v0  ;;  %v1036_v41 = vtrunc.f32 %v222_v1 }
  0x2d   : > { %v1369_v42 = vcvt.f32.s32 %v1028_v37  ;;  %v1038_v43 = vtrunc.f32 %v223_v12  ;;  %v1040_v44 = vtrunc.f32 %v224_v20  ;;  %v1042_v45 = vtrunc.f32 %v225_v21 }
  0x2e   : > { %v1371_v46 = vcvt.f32.s32 %v1030_v38  ;;  %v1373_v47 = vcvt.f32.s32 %v1032_v39  ;;  %v1375_v48 = vcvt.f32.s32 %v1034_v40  ;;  %v1377_v49 = vcvt.f32.s32 %v1036_v41 }
  0x2f   : > { %v1379_v50 = vcvt.f32.s32 %v1038_v43  ;;  %v1381_v51 = vcvt.f32.s32 %v1040_v44  ;;  %v1383_v52 = vcvt.f32.s32 %v1042_v45  ;;  %v242_v53 = vmul.u32 256, %v1353_v26 }
  0x30   : > { %v243_v54 = vmul.u32 256, %v1355_v30  ;;  %v244_v55 = vmul.u32 256, %v1357_v31  ;;  %v290_v56 = vadd.s32 1, %v1353_v26  ;;  %v291_v57 = vadd.s32 1, %v1355_v30 }
  0x31   : > { %v245_v58 = vmul.u32 256, %v1359_v32  ;;  %v246_v59 = vmul.u32 256, %v1361_v33  ;;  %v1393_v60 = vsub.s32 %v1287_v3, %v242_v53  ;;  %v292_v61 = vadd.s32 1, %v1357_v31 }
  0x32   : > { %v247_v62 = vmul.u32 256, %v1363_v34  ;;  %v248_v63 = vmul.u32 256, %v1365_v35  ;;  %v1399_v0 = vsub.s32 %v1290_v4, %v243_v54  ;;  %v1402_v1 = vsub.s32 %v1293_v5, %v244_v55 }
  0x33   : > { %v249_v12 = vmul.u32 256, %v1367_v36  ;;  %v250_v20 = vmul.u32 256, %v1369_v42  ;;  %v1407_v21 = vsub.s32 %v1296_v6, %v245_v58  ;;  %v1410_v22 = vsub.s32 %v1299_v7, %v246_v59 }
  0x34   : > { %v251_v23 = vmul.u32 256, %v1371_v46  ;;  %v252_v24 = vmul.u32 256, %v1373_v47  ;;  %v1415_v25 = vsub.s32 %v1305_v8, %v247_v62  ;;  %v1418_v2 = vsub.s32 %v1308_v9, %v248_v63 }
  0x35   : > { %v253_v27 = vmul.u32 256, %v1375_v48  ;;  %v254_v28 = vmul.u32 256, %v1377_v49  ;;  %v1423_v29 = vsub.s32 %v1311_v10, %v249_v12  ;;  %v1426_v37 = vsub.s32 %v1314_v11, %v250_v20 }
  0x36   : > { %v255_v38 = vmul.u32 256, %v1379_v50  ;;  %v256_v39 = vmul.u32 256, %v1381_v51  ;;  %v1431_v40 = vsub.s32 %v1317_v13, %v251_v23  ;;  %v1434_v41 = vsub.s32 %v1320_v14, %v252_v24 }
  0x37   : > { %v257_v43 = vmul.u32 256, %v1383_v52  ;;  %v1438_v44 = vsub.s32 %v1323_v15, %v253_v27  ;;  %v1441_v45 = vsub.s32 %v1326_v16, %v254_v28  ;;  %vm274_vm0 = vcmp.ge.s32.totalorder %v1393_v60, 256 }
  0x38   : > { %v1445_v53 = vsub.s32 %v1329_v17, %v255_v38  ;;  %v1448_v54 = vsub.s32 %v1332_v18, %v256_v39  ;;  %vm275_vm1 = vcmp.ge.s32.totalorder %v1399_v0, 256  ;;  %vm276_vm2 = vcmp.ge.s32.totalorder %v1402_v1, 256 }
  0x39   : > { %v1453_v55 = vsub.s32 %v1335_v19, %v257_v43  ;;  %vm277_vm3 = vcmp.ge.s32.totalorder %v1407_v21, 256  ;;  %vm278_vm4 = vcmp.ge.s32.totalorder %v1410_v22, 256  ;;  %vm279_vm5 = vcmp.ge.s32.totalorder %v1415_v25, 256 }
  0x3a   : > { %vm280_vm6 = vcmp.ge.s32.totalorder %v1418_v2, 256  ;;  %vm281_vm7 = vcmp.ge.s32.totalorder %v1423_v29, 256  ;;  %vm282_vm8 = vcmp.ge.s32.totalorder %v1426_v37, 256  ;;  %vm283_vm9 = vcmp.ge.s32.totalorder %v1431_v40, 256 }
  0x3b   : > { %vm284_vm10 = vcmp.ge.s32.totalorder %v1434_v41, 256  ;;  %vm285_vm11 = vcmp.ge.s32.totalorder %v1438_v44, 256  ;;  %vm286_vm12 = vcmp.ge.s32.totalorder %v1441_v45, 256  ;;  %vm287_vm13 = vcmp.ge.s32.totalorder %v1445_v53, 256 }
  0x3c   : > { %vm288_vm14 = vcmp.ge.s32.totalorder %v1448_v54, 256  ;;  %vm289_vm15 = vcmp.ge.s32.totalorder %v1453_v55, 256  ;;  %v293_v58 = vadd.s32 1, %v1359_v32  ;;  %v294_v59 = vadd.s32 1, %v1361_v33 }
  0x3d   : > { %v295_v62 = vadd.s32 1, %v1363_v34  ;;  %v296_v63 = vadd.s32 1, %v1365_v35  ;;  %v297_v12 = vadd.s32 1, %v1367_v36  ;;  %v298_v20 = vadd.s32 1, %v1369_v42 }
  0x3e   : > { %v299_v23 = vadd.s32 1, %v1371_v46  ;;  %v300_v24 = vadd.s32 1, %v1373_v47  ;;  %v301_v27 = vadd.s32 1, %v1375_v48  ;;  %v302_v28 = vadd.s32 1, %v1377_v49 }
  0x3f   : > { %v303_v38 = vadd.s32 1, %v1379_v50  ;;  %v304_v39 = vadd.s32 1, %v1381_v51  ;;  %v305_v43 = vadd.s32 1, %v1383_v52  ;;  %v306_v19 = vsel %vm274_vm0, %v290_v56, %v1353_v26 }
  0x40   : > { %v307_v18 = vsel %vm275_vm1, %v291_v57, %v1355_v30  ;;  %v308_v17 = vsel %vm276_vm2, %v292_v61, %v1357_v31  ;;  %v309_v16 = vsel %vm277_vm3, %v293_v58, %v1359_v32  ;;  %v310_v15 = vsel %vm278_vm4, %v294_v59, %v1361_v33 }
  0x41   : > { %v311_v26 = vsel %vm279_vm5, %v295_v62, %v1363_v34  ;;  %v312_v30 = vsel %vm280_vm6, %v296_v63, %v1365_v35  ;;  %v313_v31 = vsel %vm281_vm7, %v297_v12, %v1367_v36  ;;  %v314_v32 = vsel %vm282_vm8, %v298_v20, %v1369_v42 }
  0x42   : > { %v315_v33 = vsel %vm283_vm9, %v299_v23, %v1371_v46  ;;  %v316_v34 = vsel %vm284_vm10, %v300_v24, %v1373_v47  ;;  %v317_v35 = vsel %vm285_vm11, %v301_v27, %v1375_v48  ;;  %v318_v36 = vsel %vm286_vm12, %v302_v28, %v1377_v49 }
  0x43   : > { %v319_v42 = vsel %vm287_vm13, %v303_v38, %v1379_v50  ;;  %v320_v46 = vsel %vm288_vm14, %v304_v39, %v1381_v51  ;;  %v321_v47 = vsel %vm289_vm15, %v305_v43, %v1383_v52  ;;  %vm322_vm0 = vcmp.lt.s32.totalorder %v1393_v60, 0 }
  0x44   : > { %vm323_vm1 = vcmp.lt.s32.totalorder %v1399_v0, 0  ;;  %vm324_vm2 = vcmp.lt.s32.totalorder %v1402_v1, 0  ;;  %vm325_vm3 = vcmp.lt.s32.totalorder %v1407_v21, 0  ;;  %vm326_vm4 = vcmp.lt.s32.totalorder %v1410_v22, 0 }
  0x45   : > { %vm327_vm5 = vcmp.lt.s32.totalorder %v1415_v25, 0  ;;  %vm328_vm6 = vcmp.lt.s32.totalorder %v1418_v2, 0  ;;  %vm329_vm7 = vcmp.lt.s32.totalorder %v1423_v29, 0  ;;  %vm330_vm8 = vcmp.lt.s32.totalorder %v1426_v37, 0 }
  0x46   : > { %vm331_vm9 = vcmp.lt.s32.totalorder %v1431_v40, 0  ;;  %vm332_vm10 = vcmp.lt.s32.totalorder %v1434_v41, 0  ;;  %vm333_vm11 = vcmp.lt.s32.totalorder %v1438_v44, 0  ;;  %vm334_vm12 = vcmp.lt.s32.totalorder %v1441_v45, 0 }
  0x47   : > { %vm335_vm13 = vcmp.lt.s32.totalorder %v1445_v53, 0  ;;  %vm336_vm14 = vcmp.lt.s32.totalorder %v1448_v54, 0  ;;  %vm337_vm15 = vcmp.lt.s32.totalorder %v1453_v55, 0  ;;  %v974_v48 = vadd.s32 4294967295, %v306_v19 }
  0x48   : > { %v975_v49 = vadd.s32 4294967295, %v307_v18  ;;  %v976_v50 = vadd.s32 4294967295, %v308_v17  ;;  %v977_v51 = vadd.s32 4294967295, %v309_v16  ;;  %v978_v52 = vadd.s32 4294967295, %v310_v15 }
  0x49   : > { %v979_v56 = vadd.s32 4294967295, %v311_v26  ;;  %v980_v57 = vadd.s32 4294967295, %v312_v30  ;;  %v981_v61 = vadd.s32 4294967295, %v313_v31  ;;  %v982_v58 = vadd.s32 4294967295, %v314_v32 }
  0x4a   : > { %v983_v59 = vadd.s32 4294967295, %v315_v33  ;;  %v984_v62 = vadd.s32 4294967295, %v316_v34  ;;  %v985_v63 = vadd.s32 4294967295, %v317_v35  ;;  %v986_v12 = vadd.s32 4294967295, %v318_v36 }
  0x4b   : > { %v987_v20 = vadd.s32 4294967295, %v319_v42  ;;  %v988_v23 = vadd.s32 4294967295, %v320_v46  ;;  %v989_v24 = vadd.s32 4294967295, %v321_v47  ;;  %v1547_v27 = vsel %vm322_vm0, %v974_v48, %v306_v19 }
  0x4c   : > { %2229 = vst [vmem:[#allocation10_spill] sm:$0xff] %v1547_v27  ;;  %v1551_v28 = vsel %vm323_vm1, %v975_v49, %v307_v18  ;;  %v1555_v38 = vsel %vm324_vm2, %v976_v50, %v308_v17  ;;  %v1559_v39 = vsel %vm325_vm3, %v977_v51, %v309_v16  ;;  %v1563_v43 = vsel %vm326_vm4, %v978_v52, %v310_v15  ;;  %v2245_v50 = vld [vmem:[#allocation5_spill] sm:$0xff] }
  0x4d   : > { %2230 = vst [vmem:[#allocation11_spill] sm:$0xff] %v1551_v28  ;;  %2231 = vst [vmem:[#allocation12_spill] sm:$0xff] %v1555_v38  ;;  %v1567_v19 = vsel %vm327_vm5, %v979_v56, %v311_v26  ;;  %v1571_v18 = vsel %vm328_vm6, %v980_v57, %v312_v30  ;;  %v1575_v17 = vsel %vm329_vm7, %v981_v61, %v313_v31  ;;  %v370_v2 = vmul.u32 256, %v1547_v27  ;;  %v2249_v56 = vld [vmem:[#allocation7_spill] sm:$0xff]  ;;  %v2251_v61 = vld [vmem:[#allocation8_spill] sm:$0xff] }
  0x4e   : > { %2232 = vst [vmem:[#allocation13_spill] sm:$0xff] %v1567_v19  ;;  %2233 = vst [vmem:[#allocation14_spill] sm:$0xff] %v1571_v18  ;;  %v1579_v16 = vsel %vm330_vm8, %v982_v58, %v314_v32  ;;  %v1583_v15 = vsel %vm331_vm9, %v983_v59, %v315_v33  ;;  %v1587_v60 = vsel %vm332_vm10, %v984_v62, %v316_v34  ;;  %v371_v29 = vmul.u32 256, %v1551_v28  ;;  %v2253_v59 = vld [vmem:[#allocation9_spill] sm:$0xff] }
  0x4f   : > { %2234 = vst [vmem:[#allocation15_spill] sm:$0xff] %v1575_v17  ;;  %2235 = vst [vmem:[#allocation16_spill] sm:$0xff] %v1579_v16  ;;  %v1591_v0 = vsel %vm333_vm11, %v985_v63, %v317_v35  ;;  %v1595_v1 = vsel %vm334_vm12, %v986_v12, %v318_v36  ;;  %v1599_v21 = vsel %vm335_vm13, %v987_v20, %v319_v42  ;;  %v372_v37 = vmul.u32 256, %v1555_v38 }
  0x50   : > { %2236 = vst [vmem:[#allocation17_spill] sm:$0xff] %v1583_v15  ;;  %2237 = vst [vmem:[#allocation18_spill] sm:$0xff] %v1587_v60  ;;  %v1603_v22 = vsel %vm336_vm14, %v988_v23, %v320_v46  ;;  %v1607_v25 = vsel %vm337_vm15, %v989_v24, %v321_v47  ;;  %v373_v44 = vmul.u32 256, %v1559_v39  ;;  %v374_v45 = vmul.u32 256, %v1563_v43 }
  0x51   : > { %2238 = vst [vmem:[#allocation19_spill] sm:$0xff] %v1591_v0  ;;  %2239 = vst [vmem:[#allocation20_spill] sm:$0xff] %v1595_v1  ;;  %v1617_v53 = vsub.s32 %v1287_v3, %v370_v2  ;;  %v375_v55 = vmul.u32 256, %v1567_v19  ;;  %v376_v26 = vmul.u32 256, %v1571_v18  ;;  %v1623_v30 = vsub.s32 %v1290_v4, %v371_v29 }
  0x52   : > { %2240 = vst [vmem:[#allocation21_spill] sm:$0xff] %v1599_v21  ;;  %2241 = vst [vmem:[#allocation22_spill] sm:$0xff] %v1603_v22  ;;  %v1626_v31 = vsub.s32 %v1293_v5, %v372_v37  ;;  %v377_v32 = vmul.u32 256, %v1575_v17  ;;  %v378_v33 = vmul.u32 256, %v1579_v16  ;;  %v1631_v34 = vsub.s32 %v1296_v6, %v373_v44 }
  0x53   : > { %2242 = vst [vmem:[#allocation23_spill] sm:$0xff] %v1607_v25  ;;  %v1634_v3 = vsub.s32 %v1299_v7, %v374_v45  ;;  %v379_v35 = vmul.u32 256, %v1583_v15  ;;  %v380_v36 = vmul.u32 256, %v1587_v60  ;;  %v1639_v4 = vsub.s32 %v1305_v8, %v375_v55 }
  0x54   : > { %v1642_v5 = vsub.s32 %v1308_v9, %v376_v26  ;;  %v381_v42 = vmul.u32 256, %v1591_v0  ;;  %v382_v46 = vmul.u32 256, %v1595_v1  ;;  %v1647_v6 = vsub.s32 %v1311_v10, %v377_v32  ;;  %v2247_v10 = vld [vmem:[#allocation6_spill] sm:$0xff] }
  0x55   : > { %v1650_v7 = vsub.s32 %v1314_v11, %v378_v33  ;;  %v383_v47 = vmul.u32 256, %v1599_v21  ;;  %v384_v48 = vmul.u32 256, %v1603_v22  ;;  %v1655_v8 = vsub.s32 %v1317_v13, %v379_v35 }
  0x56   : > { %v1658_v9 = vsub.s32 %v1320_v14, %v380_v36  ;;  %v385_v49 = vmul.u32 256, %v1607_v25  ;;  %v1662_v51 = vsub.s32 %v2245_v50, %v381_v42  ;;  %v1665_v52 = vsub.s32 %v2247_v10, %v382_v46 }
  0x57   : > { %2243 = vst [vmem:[#allocation24_spill] sm:$0xff] %v1655_v8  ;;  %v402_v11 = vcvt.s32.f32 %v1617_v53  ;;  %v1669_v57 = vsub.s32 %v2249_v56, %v383_v47  ;;  %v1672_v58 = vsub.s32 %v2251_v61, %v384_v48  ;;  %v403_v13 = vcvt.s32.f32 %v1623_v30 }
  0x58   : > { %2244 = vst [vmem:[#allocation25_spill] sm:$0xff] %v1658_v9  ;;  %2246 = vst [vmem:[#allocation5_spill] sm:$0xff] %v1662_v51  ;;  %v404_v14 = vcvt.s32.f32 %v1626_v31  ;;  %v1677_v62 = vsub.s32 %v2253_v59, %v385_v49  ;;  %v405_v63 = vcvt.s32.f32 %v1631_v34  ;;  %v406_v12 = vcvt.s32.f32 %v1634_v3 }
  0x59   : > { %2248 = vst [vmem:[#allocation6_spill] sm:$0xff] %v1665_v52  ;;  %2250 = vst [vmem:[#allocation7_spill] sm:$0xff] %v1669_v57  ;;  %v407_v20 = vcvt.s32.f32 %v1639_v4  ;;  %v408_v23 = vcvt.s32.f32 %v1642_v5  ;;  %v409_v24 = vcvt.s32.f32 %v1647_v6  ;;  %v410_v2 = vcvt.s32.f32 %v1650_v7 }
  0x5a   : > { %2252 = vst [vmem:[#allocation8_spill] sm:$0xff] %v1672_v58  ;;  %2254 = vst [vmem:[#allocation9_spill] sm:$0xff] %v1677_v62  ;;  %v411_v29 = vcvt.s32.f32 %v1655_v8  ;;  %v412_v37 = vcvt.s32.f32 %v1658_v9  ;;  %v413_v44 = vcvt.s32.f32 %v1662_v51  ;;  %v414_v45 = vcvt.s32.f32 %v1665_v52 }
  0x5b   : > { %v415_v55 = vcvt.s32.f32 %v1669_v57  ;;  %v416_v26 = vcvt.s32.f32 %v1672_v58  ;;  %v417_v32 = vcvt.s32.f32 %v1677_v62  ;;  %v418_v33 = vmul.f32 0.0625, %v402_v11 }
  0x5c   : > { %v419_v35 = vmul.f32 0.0625, %v403_v13  ;;  %v420_v36 = vmul.f32 0.0625, %v404_v14  ;;  %v421_v42 = vmul.f32 0.0625, %v405_v63  ;;  %v422_v46 = vmul.f32 0.0625, %v406_v12 }
  0x5d   : > { %v423_v47 = vmul.f32 0.0625, %v407_v20  ;;  %v424_v48 = vmul.f32 0.0625, %v408_v23  ;;  %v425_v49 = vmul.f32 0.0625, %v409_v24  ;;  %v426_v50 = vmul.f32 0.0625, %v410_v2 }
  0x5e   : > { %v427_v10 = vmul.f32 0.0625, %v411_v29  ;;  %v428_v56 = vmul.f32 0.0625, %v412_v37  ;;  %v429_v61 = vmul.f32 0.0625, %v413_v44  ;;  %v430_v59 = vmul.f32 0.0625, %v414_v45 }
  0x5f   : > { %v431_v54 = vmul.f32 0.0625, %v415_v55  ;;  %v432_v41 = vmul.f32 0.0625, %v416_v26  ;;  %v433_v40 = vmul.f32 0.0625, %v417_v32  ;;  %v434_v38 = vfloor.f32 %v418_v33 }
  0x60   : > { %v435_v28 = vfloor.f32 %v419_v35  ;;  %v436_v27 = vfloor.f32 %v420_v36  ;;  %v437_v25 = vfloor.f32 %v421_v42  ;;  %v438_v11 = vfloor.f32 %v422_v46 }
  0x61   : > { %v439_v13 = vfloor.f32 %v423_v47  ;;  %v440_v14 = vfloor.f32 %v424_v48  ;;  %v441_v63 = vfloor.f32 %v425_v49  ;;  %v442_v12 = vfloor.f32 %v426_v50 }
  0x62   : > { %v443_v20 = vfloor.f32 %v427_v10  ;;  %v444_v23 = vfloor.f32 %v428_v56  ;;  %v445_v24 = vfloor.f32 %v429_v61  ;;  %v446_v2 = vfloor.f32 %v430_v59 }
  0x63   : > { %v447_v29 = vfloor.f32 %v431_v54  ;;  %v448_v37 = vfloor.f32 %v432_v41  ;;  %v449_v44 = vfloor.f32 %v433_v40  ;;  %v1044_v45 = vtrunc.f32 %v434_v38 }
  0x64   : > { %v1046_v55 = vtrunc.f32 %v435_v28  ;;  %v1048_v26 = vtrunc.f32 %v436_v27  ;;  %v1050_v32 = vtrunc.f32 %v437_v25  ;;  %v1052_v33 = vtrunc.f32 %v438_v11 }
  0x65   : > { %v1054_v35 = vtrunc.f32 %v439_v13  ;;  %v1692_v36 = vcvt.f32.s32 %v1044_v45  ;;  %v1056_v46 = vtrunc.f32 %v440_v14  ;;  %v1058_v47 = vtrunc.f32 %v441_v63 }
  0x66   : > { %v1694_v42 = vcvt.f32.s32 %v1046_v55  ;;  %v1696_v48 = vcvt.f32.s32 %v1048_v26  ;;  %v1698_v49 = vcvt.f32.s32 %v1050_v32  ;;  %v1700_v50 = vcvt.f32.s32 %v1052_v33 }
  0x67   : > { %v1702_v41 = vcvt.f32.s32 %v1054_v35  ;;  %v1704_v38 = vcvt.f32.s32 %v1056_v46  ;;  %v1706_v27 = vcvt.f32.s32 %v1058_v47  ;;  %v1060_v28 = vtrunc.f32 %v442_v12 }
  0x68   : > { %v1062_v25 = vtrunc.f32 %v443_v20  ;;  %v1064_v40 = vtrunc.f32 %v444_v23  ;;  %v1066_v54 = vtrunc.f32 %v445_v24  ;;  %v1068_v10 = vtrunc.f32 %v446_v2 }
  0x69   : > { %v1070_v56 = vtrunc.f32 %v447_v29  ;;  %v1708_v61 = vcvt.f32.s32 %v1060_v28  ;;  %v1072_v11 = vtrunc.f32 %v448_v37  ;;  %v1074_v13 = vtrunc.f32 %v449_v44 }
  0x6a   : > { %v1710_v59 = vcvt.f32.s32 %v1062_v25  ;;  %v1712_v14 = vcvt.f32.s32 %v1064_v40  ;;  %v1714_v63 = vcvt.f32.s32 %v1066_v54  ;;  %v1716_v45 = vcvt.f32.s32 %v1068_v10 }
  0x6b   : > { %v1718_v55 = vcvt.f32.s32 %v1070_v56  ;;  %v1720_v12 = vcvt.f32.s32 %v1072_v11  ;;  %v1722_v20 = vcvt.f32.s32 %v1074_v13  ;;  %v466_v23 = vmul.u32 16, %v1692_v36 }
  0x6c   : > { %v467_v24 = vmul.u32 16, %v1694_v42  ;;  %v468_v2 = vmul.u32 16, %v1696_v48  ;;  %v514_v37 = vadd.s32 1, %v1692_v36  ;;  %v515_v44 = vadd.s32 1, %v1694_v42 }
  0x6d   : > { %v469_v29 = vmul.u32 16, %v1698_v49  ;;  %v470_v26 = vmul.u32 16, %v1700_v50  ;;  %v1733_v33 = vsub.s32 %v1617_v53, %v466_v23  ;;  %v522_v60 = vadd.s32 1, %v1708_v61 }
  0x6e   : > { %v471_v32 = vmul.u32 16, %v1702_v41  ;;  %v1736_v35 = vsub.s32 %v1623_v30, %v467_v24  ;;  %v472_v46 = vmul.u32 16, %v1704_v38  ;;  %v1741_v28 = vsub.s32 %v1626_v31, %v468_v2 }
  0x6f   : > { %v473_v47 = vmul.u32 16, %v1706_v27  ;;  %v1744_v25 = vsub.s32 %v1631_v34, %v469_v29  ;;  %v474_v40 = vmul.u32 16, %v1708_v61  ;;  %v1749_v10 = vsub.s32 %v1634_v3, %v470_v26 }
  0x70   : > { %v475_v54 = vmul.u32 16, %v1710_v59  ;;  %v1752_v56 = vsub.s32 %v1639_v4, %v471_v32  ;;  %v476_v11 = vmul.u32 16, %v1712_v14  ;;  %v1757_v23 = vsub.s32 %v1642_v5, %v472_v46 }
  0x71   : > { %v477_v13 = vmul.u32 16, %v1714_v63  ;;  %v1760_v24 = vsub.s32 %v1647_v6, %v473_v47  ;;  %v478_v2 = vmul.u32 16, %v1716_v45  ;;  %v1765_v26 = vsub.s32 %v1650_v7, %v474_v40 }
  0x72   : > { %v479_v29 = vmul.u32 16, %v1718_v55  ;;  %v1768_v32 = vsub.s32 %v1655_v8, %v475_v54  ;;  %v480_v22 = vmul.u32 16, %v1720_v12  ;;  %v1773_v46 = vsub.s32 %v1658_v9, %v476_v11 }
  0x73   : > { %v481_v21 = vmul.u32 16, %v1722_v20  ;;  %v1776_v47 = vsub.s32 %v1662_v51, %v477_v13  ;;  %v1779_v1 = vsub.s32 %v1665_v52, %v478_v2  ;;  %vm498_vm0 = vcmp.ge.s32.totalorder %v1733_v33, 16 }
  0x74   : > { %v1782_v0 = vsub.s32 %v1669_v57, %v479_v29  ;;  %vm499_vm1 = vcmp.ge.s32.totalorder %v1736_v35, 16  ;;  %v1787_v40 = vsub.s32 %v1672_v58, %v480_v22  ;;  %vm500_vm2 = vcmp.ge.s32.totalorder %v1741_v28, 16 }
  0x75   : > { %v1790_v54 = vsub.s32 %v1677_v62, %v481_v21  ;;  %vm501_vm3 = vcmp.ge.s32.totalorder %v1744_v25, 16  ;;  %vm502_vm4 = vcmp.ge.s32.totalorder %v1749_v10, 16  ;;  %vm503_vm5 = vcmp.ge.s32.totalorder %v1752_v56, 16 }
  0x76   : > { %vm504_vm6 = vcmp.ge.s32.totalorder %v1757_v23, 16  ;;  %vm505_vm7 = vcmp.ge.s32.totalorder %v1760_v24, 16  ;;  %vm506_vm8 = vcmp.ge.s32.totalorder %v1765_v26, 16  ;;  %vm507_vm9 = vcmp.ge.s32.totalorder %v1768_v32, 16 }
  0x77   : > { %vm508_vm10 = vcmp.ge.s32.totalorder %v1773_v46, 16  ;;  %vm509_vm11 = vcmp.ge.s32.totalorder %v1776_v47, 16  ;;  %vm510_vm12 = vcmp.ge.s32.totalorder %v1779_v1, 16  ;;  %vm511_vm13 = vcmp.ge.s32.totalorder %v1782_v0, 16 }
  0x78   : > { %vm512_vm14 = vcmp.ge.s32.totalorder %v1787_v40, 16  ;;  %vm513_vm15 = vcmp.ge.s32.totalorder %v1790_v54, 16  ;;  %v516_v21 = vadd.s32 1, %v1696_v48  ;;  %v517_v22 = vadd.s32 1, %v1698_v49 }
  0x79   : > { %v518_v11 = vadd.s32 1, %v1700_v50  ;;  %v519_v13 = vadd.s32 1, %v1702_v41  ;;  %v520_v2 = vadd.s32 1, %v1704_v38  ;;  %v521_v29 = vadd.s32 1, %v1706_v27 }
  0x7a   : > { %v523_v15 = vadd.s32 1, %v1710_v59  ;;  %v524_v16 = vadd.s32 1, %v1712_v14  ;;  %v525_v17 = vadd.s32 1, %v1714_v63  ;;  %v526_v62 = vadd.s32 1, %v1716_v45 }
  0x7b   : > { %v527_v58 = vadd.s32 1, %v1718_v55  ;;  %v528_v18 = vadd.s32 1, %v1720_v12  ;;  %v529_v19 = vadd.s32 1, %v1722_v20  ;;  %v530_v57 = vsel %vm498_vm0, %v514_v37, %v1692_v36 }
  0x7c   : > { %v531_v52 = vsel %vm499_vm1, %v515_v44, %v1694_v42  ;;  %v532_v51 = vsel %vm500_vm2, %v516_v21, %v1696_v48  ;;  %v533_v9 = vsel %vm501_vm3, %v517_v22, %v1698_v49  ;;  %v534_v8 = vsel %vm502_vm4, %v518_v11, %v1700_v50 }
  0x7d   : > { %v535_v36 = vsel %vm503_vm5, %v519_v13, %v1702_v41  ;;  %v536_v42 = vsel %vm504_vm6, %v520_v2, %v1704_v38  ;;  %v537_v48 = vsel %vm505_vm7, %v521_v29, %v1706_v27  ;;  %v538_v49 = vsel %vm506_vm8, %v522_v60, %v1708_v61 }
  0x7e   : > { %v539_v50 = vsel %vm507_vm9, %v523_v15, %v1710_v59  ;;  %v540_v41 = vsel %vm508_vm10, %v524_v16, %v1712_v14  ;;  %v541_v38 = vsel %vm509_vm11, %v525_v17, %v1714_v63  ;;  %v542_v27 = vsel %vm510_vm12, %v526_v62, %v1716_v45 }
  0x7f   : > { %v543_v60 = vsel %vm511_vm13, %v527_v58, %v1718_v55  ;;  %v544_v15 = vsel %vm512_vm14, %v528_v18, %v1720_v12  ;;  %v545_v16 = vsel %vm513_vm15, %v529_v19, %v1722_v20  ;;  %vm546_vm0 = vcmp.lt.s32.totalorder %v1733_v33, 0 }
  0x80   : > { %vm547_vm1 = vcmp.lt.s32.totalorder %v1736_v35, 0  ;;  %vm548_vm2 = vcmp.lt.s32.totalorder %v1741_v28, 0  ;;  %vm549_vm3 = vcmp.lt.s32.totalorder %v1744_v25, 0  ;;  %vm550_vm4 = vcmp.lt.s32.totalorder %v1749_v10, 0 }
  0x81   : > { %vm551_vm5 = vcmp.lt.s32.totalorder %v1752_v56, 0  ;;  %vm552_vm6 = vcmp.lt.s32.totalorder %v1757_v23, 0  ;;  %vm553_vm7 = vcmp.lt.s32.totalorder %v1760_v24, 0  ;;  %vm554_vm8 = vcmp.lt.s32.totalorder %v1765_v26, 0 }
  0x82   : > { %vm555_vm9 = vcmp.lt.s32.totalorder %v1768_v32, 0  ;;  %vm556_vm10 = vcmp.lt.s32.totalorder %v1773_v46, 0  ;;  %vm557_vm11 = vcmp.lt.s32.totalorder %v1776_v47, 0  ;;  %vm558_vm12 = vcmp.lt.s32.totalorder %v1779_v1, 0 }
  0x83   : > { %vm559_vm13 = vcmp.lt.s32.totalorder %v1782_v0, 0  ;;  %vm560_vm14 = vcmp.lt.s32.totalorder %v1787_v40, 0  ;;  %vm561_vm15 = vcmp.lt.s32.totalorder %v1790_v54, 0  ;;  %v990_v19 = vadd.s32 4294967295, %v530_v57 }
  0x84   : > { %v991_v18 = vadd.s32 4294967295, %v531_v52  ;;  %v992_v17 = vadd.s32 4294967295, %v532_v51  ;;  %v993_v58 = vadd.s32 4294967295, %v533_v9  ;;  %v994_v62 = vadd.s32 4294967295, %v534_v8 }
  0x85   : > { %v995_v61 = vadd.s32 4294967295, %v535_v36  ;;  %v996_v59 = vadd.s32 4294967295, %v536_v42  ;;  %v997_v14 = vadd.s32 4294967295, %v537_v48  ;;  %v998_v63 = vadd.s32 4294967295, %v538_v49 }
  0x86   : > { %v999_v45 = vadd.s32 4294967295, %v539_v50  ;;  %v1000_v55 = vadd.s32 4294967295, %v540_v41  ;;  %v1001_v12 = vadd.s32 4294967295, %v541_v38  ;;  %v1002_v20 = vadd.s32 4294967295, %v542_v27 }
  0x87   : > { %v1003_v37 = vadd.s32 4294967295, %v543_v60  ;;  %v1004_v44 = vadd.s32 4294967295, %v544_v15  ;;  %v1005_v21 = vadd.s32 4294967295, %v545_v16  ;;  %v1886_v22 = vsel %vm546_vm0, %v990_v19, %v530_v57 }
  0x88   : > { %v1890_v11 = vsel %vm547_vm1, %v991_v18, %v531_v52  ;;  %v1894_v13 = vsel %vm548_vm2, %v992_v17, %v532_v51  ;;  %v1898_v2 = vsel %vm549_vm3, %v993_v58, %v533_v9  ;;  %v1902_v29 = vsel %vm550_vm4, %v994_v62, %v534_v8  ;;  %v2256_v17 = vld [vmem:[#allocation25_spill] sm:$0xff]  ;;  %v2259_v62 = vld [vmem:[#allocation6_spill] sm:$0xff] }
  0x89   : > { %v1906_v57 = vsel %vm551_vm5, %v995_v61, %v535_v36  ;;  %v1910_v52 = vsel %vm552_vm6, %v996_v59, %v536_v42  ;;  %v1914_v51 = vsel %vm553_vm7, %v997_v14, %v537_v48  ;;  %v1918_v9 = vsel %vm554_vm8, %v998_v63, %v538_v49  ;;  %v2257_v58 = vld [vmem:[#allocation5_spill] sm:$0xff]  ;;  %v2261_v59 = vld [vmem:[#allocation7_spill] sm:$0xff] }
  0x8a   : > { %v1922_v8 = vsel %vm555_vm9, %v999_v45, %v539_v50  ;;  %v1926_v33 = vsel %vm556_vm10, %v1000_v55, %v540_v41  ;;  %v1930_v35 = vsel %vm557_vm11, %v1001_v12, %v541_v38  ;;  %v1934_v28 = vsel %vm558_vm12, %v1002_v20, %v542_v27  ;;  %v2264_v45 = vld [vmem:[#allocation14_spill] sm:$0xff]  ;;  %v2265_v12 = vld [vmem:[#allocation8_spill] sm:$0xff] }
  0x8b   : > { %v1938_v25 = vsel %vm559_vm13, %v1003_v37, %v543_v60  ;;  %v1942_v10 = vsel %vm560_vm14, %v1004_v44, %v544_v15  ;;  %v1946_v56 = vsel %vm561_vm15, %v1005_v21, %v545_v16  ;;  %v594_v23 = vmul.u32 16, %v1886_v22  ;;  %v2255_v16 = vld [vmem:[#allocation24_spill] sm:$0xff]  ;;  %v2267_v37 = vld [vmem:[#allocation9_spill] sm:$0xff]  ;;  %v2269_v21 = vld [vmem:[#allocation15_spill] sm:$0xff] }
  0x8c   : > { %v595_v24 = vmul.u32 16, %v1890_v11  ;;  %v596_v1 = vmul.u32 16, %v1894_v13  ;;  %v629_v0 = vcvt.s32.f32 %v1559_v39  ;;  %v630_v32 = vcvt.s32.f32 %v1563_v43 }
  0x8d   : > { %v597_v26 = vmul.u32 16, %v1898_v2  ;;  %v598_v46 = vmul.u32 16, %v1902_v29  ;;  %v1957_v40 = vsub.s32 %v1617_v53, %v594_v23  ;;  %v632_v55 = vcvt.s32.f32 %v2264_v45 }
  0x8e   : > { %v599_v47 = vmul.u32 16, %v1906_v57  ;;  %v1960_v54 = vsub.s32 %v1623_v30, %v595_v24  ;;  %v600_v36 = vmul.u32 16, %v1910_v52  ;;  %v1965_v48 = vsub.s32 %v1626_v31, %v596_v1  ;;  %v2270_v24 = vld [vmem:[#allocation16_spill] sm:$0xff] }
  0x8f   : > { %v601_v42 = vmul.u32 16, %v1914_v51  ;;  %v1968_v49 = vsub.s32 %v1631_v34, %v597_v26  ;;  %v602_v50 = vmul.u32 16, %v1918_v9  ;;  %v1973_v53 = vsub.s32 %v1634_v3, %v598_v46  ;;  %v2271_v26 = vld [vmem:[#allocation17_spill] sm:$0xff] }
  0x90   : > { %v603_v41 = vmul.u32 16, %v1922_v8  ;;  %v1976_v30 = vsub.s32 %v1639_v4, %v599_v47  ;;  %v604_v38 = vmul.u32 16, %v1926_v33  ;;  %v1981_v31 = vsub.s32 %v1642_v5, %v600_v36  ;;  %v2272_v47 = vld [vmem:[#allocation18_spill] sm:$0xff] }
  0x91   : > { %v605_v27 = vmul.u32 16, %v1930_v35  ;;  %v1984_v34 = vsub.s32 %v1647_v6, %v601_v42  ;;  %v606_v60 = vmul.u32 16, %v1934_v28  ;;  %v1989_v3 = vsub.s32 %v1650_v7, %v602_v50  ;;  %v2263_v7 = vld [vmem:[#allocation13_spill] sm:$0xff]  ;;  %v2273_v42 = vld [vmem:[#allocation19_spill] sm:$0xff] }
  0x92   : > { %v607_v15 = vmul.u32 16, %v1938_v25  ;;  %v1992_v4 = vsub.s32 %v2255_v16, %v603_v41  ;;  %v608_v19 = vmul.u32 16, %v1942_v10  ;;  %v1997_v5 = vsub.s32 %v2256_v17, %v604_v38  ;;  %v2274_v41 = vld [vmem:[#allocation20_spill] sm:$0xff] }
  0x93   : > { %v609_v18 = vmul.u32 16, %v1946_v56  ;;  %v2000_v6 = vsub.s32 %v2257_v58, %v605_v27  ;;  %v2003_v61 = vsub.s32 %v2259_v62, %v606_v60  ;;  %v631_v63 = vcvt.s32.f32 %v2263_v7  ;;  %v2275_v27 = vld [vmem:[#allocation21_spill] sm:$0xff]  ;;  %v2280_v7 = vld [vmem:[#allocation11_spill] sm:$0xff] }
  0x94   : > { %v2006_v14 = vsub.s32 %v2261_v59, %v607_v15  ;;  %v2011_v20 = vsub.s32 %v2265_v12, %v608_v19  ;;  %v633_v23 = vcvt.s32.f32 %v2269_v21  ;;  %v634_v1 = vcvt.s32.f32 %v2270_v24  ;;  %v2276_v15 = vld [vmem:[#allocation22_spill] sm:$0xff]  ;;  %v2277_v19 = vld [vmem:[#allocation23_spill] sm:$0xff] }
  0x95   : > { %2258 = vst [vmem:[#allocation24_spill] sm:$0xff] %v2000_v6  ;;  %2260 = vst [vmem:[#allocation25_spill] sm:$0xff] %v2003_v61  ;;  %v2014_v44 = vsub.s32 %v2267_v37, %v609_v18  ;;  %v635_v46 = vcvt.s32.f32 %v2271_v26  ;;  %v636_v36 = vcvt.s32.f32 %v2272_v47  ;;  %v637_v50 = vcvt.s32.f32 %v2273_v42  ;;  %v2278_v12 = vld [vmem:[#allocation10_spill] sm:$0xff] }
  0x96   : > { %2262 = vst [vmem:[#allocation5_spill] sm:$0xff] %v2006_v14  ;;  %2266 = vst [vmem:[#allocation6_spill] sm:$0xff] %v2011_v20  ;;  %v638_v38 = vcvt.s32.f32 %v2274_v41  ;;  %v639_v60 = vcvt.s32.f32 %v2275_v27  ;;  %v640_v16 = vcvt.s32.f32 %v2276_v15  ;;  %v641_v17 = vcvt.s32.f32 %v2277_v19  ;;  %v710_v41 = vpop.permute.xlu0 %709  ;;  %v2282_v15 = vld [vmem:[#allocation12_spill] sm:$0xff] }
  0x97   : > { %2268 = vst [vmem:[#allocation7_spill] sm:$0xff] %v2014_v44  ;;  %v2279_v42 = vcvt.s32.f32 %v2278_v12  ;;  %v2281_v27 = vcvt.s32.f32 %v2280_v7  ;;  %v2283_v62 = vcvt.s32.f32 %v2282_v15  ;;  %v677_v37 = vmul.f32 2.0, %v629_v0 }
  0x98   : > { %v678_v24 = vmul.f32 2.0, %v630_v32  ;;  %v679_v21 = vmul.f32 2.0, %v631_v63  ;;  %v680_v26 = vmul.f32 2.0, %v632_v55  ;;  %v681_v58 = vmul.f32 2.0, %v633_v23 }
  0x99   : > { %v674_v45 = vmul.f32 2.0, %v2279_v42  ;;  %v675_v59 = vmul.f32 2.0, %v2281_v27  ;;  %v676_v19 = vmul.f32 2.0, %v2283_v62  ;;  %v682_v47 = vmul.f32 2.0, %v634_v1 }
  0x9a   : > { %v683_v18 = vmul.f32 2.0, %v635_v46  ;;  %v684_v12 = vmul.f32 2.0, %v636_v36  ;;  %v685_v42 = vmul.f32 2.0, %v637_v50  ;;  %v686_v44 = vmul.f32 2.0, %v638_v38 }
  0x9b   : > { %v687_v20 = vmul.f32 2.0, %v639_v60  ;;  %v688_v7 = vmul.f32 2.0, %v640_v16  ;;  %v689_v27 = vmul.f32 2.0, %v641_v17  ;;  %v712_v14 = vsub.f32 %v710_v41, %v674_v45  ;;  %v746_v60 = vpop.permute.xlu0 %745 }
  0x9c   : > { %v713_v15 = vsub.f32 %v710_v41, %v675_v59  ;;  %v714_v62 = vsub.f32 %v710_v41, %v676_v19  ;;  %v715_v61 = vsub.f32 %v710_v41, %v677_v37  ;;  %v716_v39 = vsub.f32 %v710_v41, %v678_v24 }
  0x9d   : > { %v717_v0 = vsub.f32 %v710_v41, %v679_v21  ;;  %v718_v6 = vsub.f32 %v710_v41, %v680_v26  ;;  %v719_v43 = vsub.f32 %v710_v41, %v681_v58  ;;  %v720_v32 = vsub.f32 %v710_v41, %v682_v47 }
  0x9e   : > { %v721_v63 = vsub.f32 %v710_v41, %v683_v18  ;;  %v722_v55 = vsub.f32 %v710_v41, %v684_v12  ;;  %v723_v23 = vsub.f32 %v710_v41, %v685_v42  ;;  %v724_v1 = vsub.f32 %v710_v41, %v686_v44 }
  0x9f   : > { %v725_v46 = vsub.f32 %v710_v41, %v687_v20  ;;  %v726_v36 = vsub.f32 %v710_v41, %v688_v7  ;;  %v727_v50 = vsub.f32 %v710_v41, %v689_v27  ;;  %v728_v38 = vmul.f32 %v712_v14, %v712_v14 }
  0xa0   : > { %v729_v16 = vmul.f32 %v713_v15, %v713_v15  ;;  %v730_v17 = vmul.f32 %v714_v62, %v714_v62  ;;  %v731_v45 = vmul.f32 %v715_v61, %v715_v61  ;;  %v732_v59 = vmul.f32 %v716_v39, %v716_v39 }
  0xa1   : > { %v733_v19 = vmul.f32 %v717_v0, %v717_v0  ;;  %v734_v37 = vmul.f32 %v718_v6, %v718_v6  ;;  %v735_v24 = vmul.f32 %v719_v43, %v719_v43  ;;  %v736_v21 = vmul.f32 %v720_v32, %v720_v32 }
  0xa2   : > { %v737_v26 = vmul.f32 %v721_v63, %v721_v63  ;;  %v738_v58 = vmul.f32 %v722_v55, %v722_v55  ;;  %v739_v47 = vmul.f32 %v723_v23, %v723_v23  ;;  %v740_v18 = vmul.f32 %v724_v1, %v724_v1 }
  0xa3   : > { %v741_v12 = vmul.f32 %v725_v46, %v725_v46  ;;  %v742_v42 = vmul.f32 %v726_v36, %v726_v36  ;;  %v743_v44 = vmul.f32 %v727_v50, %v727_v50  ;;  %v2284_v20 = vcvt.s32.f32 %v1886_v22 }
  0xa4   : > { %v2285_v14 = vcvt.s32.f32 %v1890_v11  ;;  %v2286_v61 = vcvt.s32.f32 %v1894_v13  ;;  %v2287_v6 = vcvt.s32.f32 %v1898_v2  ;;  %v2288_v62 = vcvt.s32.f32 %v1902_v29 }
  0xa5   : > { %v748_v41 = vsub.f32 %v746_v60, %v2284_v20  ;;  %v2289_v0 = vcvt.s32.f32 %v1906_v57  ;;  %v2290_v32 = vcvt.s32.f32 %v1910_v52  ;;  %v2291_v22 = vcvt.s32.f32 %v1914_v51 }
  0xa6   : > { %v749_v7 = vsub.f32 %v746_v60, %v2285_v14  ;;  %v750_v27 = vsub.f32 %v746_v60, %v2286_v61  ;;  %v751_v15 = vsub.f32 %v746_v60, %v2287_v6  ;;  %v752_v39 = vsub.f32 %v746_v60, %v2288_v62 }
  0xa7   : > { %v753_v43 = vsub.f32 %v746_v60, %v2289_v0  ;;  %v754_v63 = vsub.f32 %v746_v60, %v2290_v32  ;;  %v755_v55 = vsub.f32 %v746_v60, %v2291_v22  ;;  %v2292_v11 = vcvt.s32.f32 %v1918_v9 }
  0xa8   : > { %v2293_v13 = vcvt.s32.f32 %v1922_v8  ;;  %v2294_v2 = vcvt.s32.f32 %v1926_v33  ;;  %v2295_v29 = vcvt.s32.f32 %v1930_v35  ;;  %v2296_v57 = vcvt.s32.f32 %v1934_v28 }
  0xa9   : > { %v756_v23 = vsub.f32 %v746_v60, %v2292_v11  ;;  %v2297_v52 = vcvt.s32.f32 %v1938_v25  ;;  %v2298_v51 = vcvt.s32.f32 %v1942_v10  ;;  %v2299_v9 = vcvt.s32.f32 %v1946_v56 }
  0xaa   : > { %v757_v1 = vsub.f32 %v746_v60, %v2293_v13  ;;  %v758_v46 = vsub.f32 %v746_v60, %v2294_v2  ;;  %v759_v36 = vsub.f32 %v746_v60, %v2295_v29  ;;  %v760_v50 = vsub.f32 %v746_v60, %v2296_v57 }
  0xab   : > { %v761_v20 = vsub.f32 %v746_v60, %v2297_v52  ;;  %v762_v14 = vsub.f32 %v746_v60, %v2298_v51  ;;  %v763_v61 = vsub.f32 %v746_v60, %v2299_v9  ;;  %v764_v8 = vmul.f32 %v748_v41, %v748_v41  ;;  %v798_v51 = vpop.permute.xlu1 %797 }
  0xac   : > { %v765_v6 = vmul.f32 %v749_v7, %v749_v7  ;;  %v766_v62 = vmul.f32 %v750_v27, %v750_v27  ;;  %v767_v33 = vmul.f32 %v751_v15, %v751_v15  ;;  %v768_v0 = vmul.f32 %v752_v39, %v752_v39 }
  0xad   : > { %v769_v32 = vmul.f32 %v753_v43, %v753_v43  ;;  %v770_v35 = vmul.f32 %v754_v63, %v754_v63  ;;  %v771_v22 = vmul.f32 %v755_v55, %v755_v55  ;;  %v772_v11 = vmul.f32 %v756_v23, %v756_v23 }
  0xae   : > { %v773_v28 = vmul.f32 %v757_v1, %v757_v1  ;;  %v774_v13 = vmul.f32 %v758_v46, %v758_v46  ;;  %v775_v2 = vmul.f32 %v759_v36, %v759_v36  ;;  %v776_v25 = vmul.f32 %v760_v50, %v760_v50 }
  0xaf   : > { %v777_v29 = vmul.f32 %v761_v20, %v761_v20  ;;  %v778_v57 = vmul.f32 %v762_v14, %v762_v14  ;;  %v779_v10 = vmul.f32 %v763_v61, %v763_v61  ;;  %v780_v52 = vadd.f32 %v764_v8, %v728_v38  ;;  %v2313_v61 = vld [vmem:[#allocation25_spill] sm:$0xff] }
  0xb0   : > { %v781_v56 = vadd.f32 %v765_v6, %v729_v16  ;;  %v782_v60 = vadd.f32 %v766_v62, %v730_v17  ;;  %v783_v41 = vadd.f32 %v767_v33, %v731_v45  ;;  %v784_v7 = vadd.f32 %v768_v0, %v732_v59  ;;  %v2315_v6 = vld [vmem:[#allocation5_spill] sm:$0xff]  ;;  %v2317_v33 = vld [vmem:[#allocation6_spill] sm:$0xff] }
  0xb1   : > { %v785_v27 = vadd.f32 %v769_v32, %v733_v19  ;;  %v786_v15 = vadd.f32 %v770_v35, %v734_v37  ;;  %v787_v39 = vadd.f32 %v771_v22, %v735_v24  ;;  %v788_v43 = vadd.f32 %v772_v11, %v736_v21  ;;  %v2319_v32 = vld [vmem:[#allocation7_spill] sm:$0xff] }
  0xb2   : > { %v789_v63 = vadd.f32 %v773_v28, %v737_v26  ;;  %v790_v55 = vadd.f32 %v774_v13, %v738_v58  ;;  %v791_v23 = vadd.f32 %v775_v2, %v739_v47  ;;  %v792_v1 = vadd.f32 %v776_v25, %v740_v18 }
  0xb3   : > { %v793_v46 = vadd.f32 %v777_v29, %v741_v12  ;;  %v794_v36 = vadd.f32 %v778_v57, %v742_v42  ;;  %v795_v50 = vadd.f32 %v779_v10, %v743_v44  ;;  %v2300_v20 = vcvt.s32.f32 %v1957_v40 }
  0xb4   : > { %v2301_v16 = vcvt.s32.f32 %v1960_v54  ;;  %v2302_v45 = vcvt.s32.f32 %v1965_v48  ;;  %v2303_v19 = vcvt.s32.f32 %v1968_v49  ;;  %v2304_v24 = vcvt.s32.f32 %v1973_v53  ;;  %v2311_v53 = vld [vmem:[#allocation24_spill] sm:$0xff] }
  0xb5   : > { %v800_v38 = vsub.f32 %v798_v51, %v2300_v20  ;;  %v2305_v26 = vcvt.s32.f32 %v1976_v30  ;;  %v2306_v47 = vcvt.s32.f32 %v1981_v31  ;;  %v2307_v40 = vcvt.s32.f32 %v1984_v34 }
  0xb6   : > { %v801_v17 = vsub.f32 %v798_v51, %v2301_v16  ;;  %v802_v59 = vsub.f32 %v798_v51, %v2302_v45  ;;  %v803_v37 = vsub.f32 %v798_v51, %v2303_v19  ;;  %v804_v21 = vsub.f32 %v798_v51, %v2304_v24 }
  0xb7   : > { %v805_v58 = vsub.f32 %v798_v51, %v2305_v26  ;;  %v806_v18 = vsub.f32 %v798_v51, %v2306_v47  ;;  %v807_v12 = vsub.f32 %v798_v51, %v2307_v40  ;;  %v2308_v54 = vcvt.s32.f32 %v1989_v3 }
  0xb8   : > { %v2309_v48 = vcvt.s32.f32 %v1992_v4  ;;  %v2310_v49 = vcvt.s32.f32 %v1997_v5  ;;  %v2312_v9 = vcvt.s32.f32 %v2311_v53  ;;  %v2314_v8 = vcvt.s32.f32 %v2313_v61 }
  0xb9   : > { %v808_v42 = vsub.f32 %v798_v51, %v2308_v54  ;;  %v2316_v34 = vcvt.s32.f32 %v2315_v6  ;;  %v2318_v3 = vcvt.s32.f32 %v2317_v33  ;;  %v2320_v4 = vcvt.s32.f32 %v2319_v32 }
  0xba   : > { %v809_v44 = vsub.f32 %v798_v51, %v2309_v48  ;;  %v810_v14 = vsub.f32 %v798_v51, %v2310_v49  ;;  %v811_v30 = vsub.f32 %v798_v51, %v2312_v9  ;;  %v812_v31 = vsub.f32 %v798_v51, %v2314_v8 }
  0xbb   : > { %v813_v62 = vsub.f32 %v798_v51, %v2316_v34  ;;  %v814_v0 = vsub.f32 %v798_v51, %v2318_v3  ;;  %v815_v35 = vsub.f32 %v798_v51, %v2320_v4  ;;  %v816_v22 = vmul.f32 %v800_v38, %v800_v38 }
  0xbc   : > { %v817_v5 = vmul.f32 %v801_v17, %v801_v17  ;;  %v818_v11 = vmul.f32 %v802_v59, %v802_v59  ;;  %v819_v28 = vmul.f32 %v803_v37, %v803_v37  ;;  %v820_v13 = vmul.f32 %v804_v21, %v804_v21 }
  0xbd   : > { %v821_v2 = vmul.f32 %v805_v58, %v805_v58  ;;  %v822_v25 = vmul.f32 %v806_v18, %v806_v18  ;;  %v823_v29 = vmul.f32 %v807_v12, %v807_v12  ;;  %v824_v57 = vmul.f32 %v808_v42, %v808_v42 }
  0xbe   : > { %v825_v10 = vmul.f32 %v809_v44, %v809_v44  ;;  %v826_v20 = vmul.f32 %v810_v14, %v810_v14  ;;  %v827_v16 = vmul.f32 %v811_v30, %v811_v30  ;;  %v828_v45 = vmul.f32 %v812_v31, %v812_v31 }
  0xbf   : > { %v829_v19 = vmul.f32 %v813_v62, %v813_v62  ;;  %v830_v24 = vmul.f32 %v814_v0, %v814_v0  ;;  %v831_v26 = vmul.f32 %v815_v35, %v815_v35  ;;  %v832_v51 = vadd.f32 %v816_v22, %v780_v52 }
  0xc0   : > { %v833_v38 = vadd.f32 %v817_v5, %v781_v56  ;;  %v834_v17 = vadd.f32 %v818_v11, %v782_v60  ;;  %v835_v59 = vadd.f32 %v819_v28, %v783_v41  ;;  %v836_v37 = vadd.f32 %v820_v13, %v784_v7 }
  0xc1   : > { %v837_v21 = vadd.f32 %v821_v2, %v785_v27  ;;  %v838_v58 = vadd.f32 %v822_v25, %v786_v15  ;;  %v839_v47 = vadd.f32 %v823_v29, %v787_v39  ;;  %v840_v18 = vadd.f32 %v824_v57, %v788_v43 }
  0xc2   : > { %v841_v40 = vadd.f32 %v825_v10, %v789_v63  ;;  %v842_v12 = vadd.f32 %v826_v20, %v790_v55  ;;  %v843_v54 = vadd.f32 %v827_v16, %v791_v23  ;;  %v844_v42 = vadd.f32 %v828_v45, %v792_v1 }
  0xc3   : > { %v845_v48 = vadd.f32 %v829_v19, %v793_v46  ;;  %v846_v44 = vadd.f32 %v830_v24, %v794_v36  ;;  %v847_v49 = vadd.f32 %v831_v26, %v795_v50  ;;  %v848_v14 = vsub.f32 0.0, %v832_v51 }
  0xc4   : > { %v849_v53 = vsub.f32 0.0, %v833_v38  ;;  %v850_v52 = vsub.f32 0.0, %v834_v17  ;;  %v851_v56 = vsub.f32 0.0, %v835_v59  ;;  %v852_v60 = vsub.f32 0.0, %v836_v37 }
  0xc5   : > { %v853_v41 = vsub.f32 0.0, %v837_v21  ;;  %v854_v7 = vsub.f32 0.0, %v838_v58  ;;  %v855_v27 = vsub.f32 0.0, %v839_v47  ;;  %v856_v15 = vsub.f32 0.0, %v840_v18  ;;  %864 = vst [vmem:[%s121_s28] sm:$0xff] %v848_v14 }
  0xc6   : > { %v857_v39 = vsub.f32 0.0, %v841_v40  ;;  %v858_v43 = vsub.f32 0.0, %v842_v12  ;;  %v859_v63 = vsub.f32 0.0, %v843_v54  ;;  %v860_v55 = vsub.f32 0.0, %v844_v42  ;;  %865 = vst [vmem:[%s121_s28 + $0x8] sm:$0xff] %v849_v53  ;;  %866 = vst [vmem:[%s121_s28 + $0x10] sm:$0xff] %v850_v52 }
  0xc7   : > { %867 = vst [vmem:[%s121_s28 + $0x18] sm:$0xff] %v851_v56  ;;  %868 = vst [vmem:[%s121_s28 + $0x20] sm:$0xff] %v852_v60  ;;  %v861_v23 = vsub.f32 0.0, %v845_v48  ;;  %v862_v1 = vsub.f32 0.0, %v846_v44  ;;  %v863_v46 = vsub.f32 0.0, %v847_v49 }
  0xc8   : > { %869 = vst [vmem:[%s121_s28 + $0x28] sm:$0xff] %v853_v41  ;;  %870 = vst [vmem:[%s121_s28 + $0x30] sm:$0xff] %v854_v7 }
  0xc9   : > { %871 = vst [vmem:[%s121_s28 + $0x38] sm:$0xff] %v855_v27  ;;  %872 = vst [vmem:[%s121_s28 + $0x40] sm:$0xff] %v856_v15 }
  0xca   : > { %873 = vst [vmem:[%s121_s28 + $0x48] sm:$0xff] %v857_v39  ;;  %874 = vst [vmem:[%s121_s28 + $0x50] sm:$0xff] %v858_v43 }
  0xcb   : > { %875 = vst [vmem:[%s121_s28 + $0x58] sm:$0xff] %v859_v63  ;;  %876 = vst [vmem:[%s121_s28 + $0x60] sm:$0xff] %v860_v55 }
  0xcc   : > { %877 = vst [vmem:[%s121_s28 + $0x68] sm:$0xff] %v861_v23  ;;  %878 = vst [vmem:[%s121_s28 + $0x70] sm:$0xff] %v862_v1 }
  0xcd   : > { %879 = vst [vmem:[%s121_s28 + $0x78] sm:$0xff] %v863_v46 }
  0xce   : > { %1151 = shalt.err (!%p1148_p5)
}
  0xcf   : > { %s1152_s15 = scalar_lea.hbm %s2141_s3, 2048  ;;  %s1156_s21 = scalar_lea.hbm %s2190_s1, 4096 }
  0xd0   : > { %p1153_p6 = scmp.ne.s32.totalorder %s2141_s3, %s1152_s15  ;;  %p1157_p10 = scmp.lt.s32.totalorder %s2141_s3, %s2190_s1 }
  0xd1   : > { %p1158_p11 = scmp.lt.s32.totalorder %s1156_s21, %s1152_s15 }
  0xd2   : > { %p1154_p7 = pnand %p1153_p6, %p1270_p4 }
  0xd3   : > { %p1159_p12 = por %p1158_p11, %p1157_p10 }
  0xd4   : > { %p1155_p9 = pneg %p1154_p7 }
  0xd6   : > { %p1160_p13 = pnand %p1159_p12, %p1155_p9 }
  0xd8   : > { %1163 = shalt.err (!%p1160_p13)
}
  0xd9   : > { %1076 = dma.vmem_to_hbm [thread:$0]  (%p1270_p4), %s2143_s29, 2048, %s2141_s3, %s881_s4  }
  0xda PF: > { %p1082_p0 = scmp.ge.s32.totalorder %s1214_s11, 2  ;;  %s909_s24 = sand.u32 1, %s1194_s6  }
  0xdb   : > { %s910_s25 = scalar_lea.sflag [#allocation3], %s909_s24 }
  0xdc   : > { %p1079_p1 = pnand %p1082_p0, %p1277_p8 }
  0xde   : > { %p1080_p2 = pneg %p1079_p1 }
  0xe0   : > { %1189 = dma.done.wait (%p1080_p2), %s910_s25, 2048  }
  0xe1   : > { %1191 = vsyncadd (%p1080_p2), %s910_s25, 4294965248  ;;  %s14_s11 = sadd.s32 1, %s1214_s11   ;;  %s2321_s6 = smov %s1198_s7 }
  0xe2   : > { %p11_p3 = scmp.ge.s32.totalorder %s14_s11, 4   ;;  %s2322_s7 = smov %s1202_s8 }
  0xe3   : > { %s2323_s8 = smov %s1283_s19  ;;  %s2324_s9 = smov %s1210_s10 }
  0xe4   : > { %s2325_s10 = smov %s2327_s14  ;;  %13 = sbr.rel (!%p11_p3) target bundleno = 4 (0x4), region = 59 }
  0xe9   :  { %915 = vsyncpa [#allocation3], 1 }
  0xea   :  { %917 = vsyncpa [#allocation3 + $0x1], 1 }

</bundles_post_ra>
